<compile_context>
chip_gen: v6e
topology: v6e:2x2x1
jax: 0.10.0
libtpu: 0.0.40
codegen_flags: <defaults>
</compile_context>

<pallas_src>
import functools

import jax
import jax.numpy as jnp
import numpy as np
from jax.experimental import pallas as pl
from jax.experimental.pallas import tpu as pltpu

_VMEM_LIMIT = 32 * 1024 * 1024   # explicit: > v5e's 16 MiB default, < v7x's 64 MiB/TC


def _pick_tile(n, cap=512):
    """Largest divisor of n that is a multiple of 16 and <= cap, else n (full)."""
    for t in (1024, 512, 256, 128, 64, 32, 16):
        if t <= cap and n % t == 0:
            return t
    return n


# --------------------------------------------------------------------------
# Pallas kernel 1: spectral mode mixing (both FFT directions in one call).
#   For grid point (d, k, b, l):
#     e  = emb[d,k,b]                complex scalar, read from SMEM
#     z  = [Re(x_ft) | Im(x_ft)]     (TL, 2C) bf16 tile
#     out = z @ ( er*Wcat + ei*Wrot ).bf16     one MXU push, [Re | Im] (TL, 2O)
# --------------------------------------------------------------------------
def _spectral_mix_kernel(emb_ref, z_ref, wcat_ref, wrot_ref, o_ref, *, n_modes, batch):
    d = pl.program_id(0)
    k = pl.program_id(1)
    b = pl.program_id(2)
    base = ((d * n_modes + k) * batch + b) * 2
    er = emb_ref[base]            # f32 scalars from SMEM
    ei = emb_ref[base + 1]
    # real-form weight of multiplication by (er + i*ei) followed by W:
    #   W_eff = er*[[Wr,Wi],[-Wi,Wr]] + ei*[[-Wi,Wr],[-Wr,-Wi]]      (2C, 2O)
    w = (er * wcat_ref[0, 0] + ei * wrot_ref[0, 0]).astype(jnp.bfloat16)
    z = z_ref[0, 0, 0]            # (TL, 2C) bf16
    o = jnp.dot(z, w, preferred_element_type=jnp.float32)            # (TL, 2O)
    o_ref[0, 0, 0] = o.astype(jnp.bfloat16)


def spectral_mix(emb_flat, z, wcat, wrot, tile_l=512):
    """emb_flat: (D*K*B*2,) f32 (SMEM); z: (D,K,B,L,2C) bf16;
    wcat/wrot: (D,K,2C,2O) f32.  Returns (D,K,B,L,2O) bf16 = [Re | Im]."""
    D, K, B, L, C2 = z.shape
    O2 = wcat.shape[-1]
    TL = _pick_tile(L, tile_l)
    kernel = functools.partial(_spectral_mix_kernel, n_modes=K, batch=B)
    spec_z = pl.BlockSpec((1, 1, 1, TL, C2), lambda d, k, b, l: (d, k, b, l, 0))
    spec_w = pl.BlockSpec((1, 1, C2, O2), lambda d, k, b, l: (d, k, 0, 0))   # resident
    spec_o = pl.BlockSpec((1, 1, 1, TL, O2), lambda d, k, b, l: (d, k, b, l, 0))
    # TODO(synk): when 2*C / 2*O < 128 (tiny channel counts) a lane-padded
    # variant would make loads/stores fully lane-dense; at realistic C=64 the
    # fused 2C=128 / 2O=128 shapes are already exact.
    return pl.pallas_call(
        kernel,
        out_shape=jax.ShapeDtypeStruct((D, K, B, L, O2), jnp.bfloat16),
        grid=(D, K, B, L // TL),
        in_specs=[pl.BlockSpec(memory_space=pltpu.MemorySpace.SMEM),
                  spec_z, spec_w, spec_w],
        out_specs=spec_o,
        compiler_params=pltpu.CompilerParams(
            dimension_semantics=("parallel", "parallel", "parallel", "parallel"),
            vmem_limit_bytes=_VMEM_LIMIT),
    )(emb_flat, z, wcat, wrot)


# --------------------------------------------------------------------------
# Pallas kernel 2: backcast FeedForward (Linear->ReLU->Linear->LayerNorm)
# fused with the dt-embedding scale, tiled over the flattened spatial dim.
# --------------------------------------------------------------------------
def _ff_scale_kernel(x_ref, w1_ref, b1_ref, w2_ref, b2_ref, g_ref, bt_ref,
                     dt_ref, o_ref):
    x = x_ref[0]                                                   # (TS, C) bf16
    h = jnp.dot(x, w1_ref[...], preferred_element_type=jnp.float32) + b1_ref[...]
    h = jnp.maximum(h, 0.0)                                        # ReLU
    y = (jnp.dot(h.astype(jnp.bfloat16), w2_ref[...],
                 preferred_element_type=jnp.float32) + b2_ref[...])
    # two-pass LayerNorm (eps = 1e-5): subtract mean, then square (no E[y^2]-mu^2
    # cancellation); y is already register/VMEM resident so this is cheap.
    mu = jnp.mean(y, axis=-1, keepdims=True)
    yc = y - mu
    var = jnp.mean(yc * yc, axis=-1, keepdims=True)
    y = yc * jax.lax.rsqrt(var + 1e-5)
    y = y * g_ref[...] + bt_ref[...]
    o_ref[0] = y * dt_ref[0]                                       # dt_emb * backcast


def ff_scale(x, w1, b1, w2, b2, gamma, beta, dt_emb, tile_s=512):
    """x: (B,S,C) bf16; w1: (C,Cf) bf16; w2: (Cf,C) bf16; b1 (1,Cf),
    b2/gamma/beta (1,C), dt_emb (B,1,C) f32."""
    B, S, C = x.shape
    Cf = w1.shape[1]
    TS = _pick_tile(S, tile_s)
    # TODO(synk): with C < 128 the output stores are lane-masked; a channel-
    # padded variant would trade masked stores for extra write bytes.
    # TODO(synk): on v6e, pipeline_mode=pl.Buffered(3) on the x/out specs can
    # spend spare VMEM on deeper buffering.
    return pl.pallas_call(
        _ff_scale_kernel,
        out_shape=jax.ShapeDtypeStruct((B, S, C), jnp.float32),
        grid=(B, S // TS),
        in_specs=[
            pl.BlockSpec((1, TS, C), lambda b, s: (b, s, 0)),
            pl.BlockSpec((C, Cf), lambda b, s: (0, 0)),
            pl.BlockSpec((1, Cf), lambda b, s: (0, 0)),
            pl.BlockSpec((Cf, C), lambda b, s: (0, 0)),
            pl.BlockSpec((1, C), lambda b, s: (0, 0)),
            pl.BlockSpec((1, C), lambda b, s: (0, 0)),
            pl.BlockSpec((1, C), lambda b, s: (0, 0)),
            pl.BlockSpec((1, 1, C), lambda b, s: (b, 0, 0)),
        ],
        out_specs=pl.BlockSpec((1, TS, C), lambda b, s: (b, s, 0)),
        compiler_params=pltpu.CompilerParams(
            dimension_semantics=("parallel", "parallel"),
            vmem_limit_bytes=_VMEM_LIMIT),
    )(x, w1, b1, w2, b2, gamma, beta, dt_emb)


# --------------------------------------------------------------------------
# Module wrapper (mode='full', in_dim == out_dim, square spatial M == N)
# --------------------------------------------------------------------------
def init_params(key, in_dim, out_dim, cond_dim, n_modes, factor):
    assert in_dim == out_dim
    ks = jax.random.split(key, 10)
    scale_freq = 1.0 / (2 * out_dim + 4 * n_modes)
    xavier = np.sqrt(2.0 / (in_dim + out_dim))
    p = {
        # cond_emb[0]: Linear(cond_dim, 2*out_dim)
        'Wc': 0.1 * jax.random.normal(ks[0], (2 * out_dim, cond_dim), jnp.float32),
        'bc': 0.1 * jax.random.normal(ks[1], (2 * out_dim,), jnp.float32),
        # FreqLinear proj: Linear(2*out_dim, 4*n_modes)
        'Wp': scale_freq * jax.random.normal(ks[2], (4 * n_modes, 2 * out_dim), jnp.float32),
        'bp': jnp.zeros((4 * n_modes,), jnp.float32),
        # dt_emb: Linear(1, out_dim)
        'Wd': 0.1 * jax.random.normal(ks[3], (out_dim, 1), jnp.float32),
        'bd': 0.1 * jax.random.normal(ks[4], (out_dim,), jnp.float32),
        # fourier weights: (in_dim, out_dim, n_modes, 2) x 2
        'w0': xavier * jax.random.normal(ks[5], (in_dim, out_dim, n_modes, 2), jnp.float32),
        'w1': xavier * jax.random.normal(ks[6], (in_dim, out_dim, n_modes, 2), jnp.float32),
        # backcast FeedForward (n_ff_layers=2, layer_norm=True)
        'W1': 0.1 * jax.random.normal(ks[7], (out_dim * factor, out_dim), jnp.float32),
        'b1': 0.05 * jax.random.normal(ks[8], (out_dim * factor,), jnp.float32),
        'W2': 0.1 * jax.random.normal(ks[9], (out_dim, out_dim * factor), jnp.float32),
        'b2': jnp.zeros((out_dim,), jnp.float32),
        'gamma': jnp.ones((out_dim,), jnp.float32),
        'beta': jnp.zeros((out_dim,), jnp.float32),
    }
    return p


def spectral_conv2d_forward(x, dt, emb, p, n_modes):
    """x: (B, M, N, C) channels-last; dt: (B, 1); emb: (B, cond_dim)."""
    B, M, N, C = x.shape
    K = n_modes
    assert M == N  # TODO(synk): non-square spatial ('flip') path not wired.

    # ---- cond_emb: Linear -> GELU -> FreqLinear (tiny; plain JAX glue) ----
    h = jax.nn.gelu(emb @ p['Wc'].T + p['bc'], approximate=False)
    hf = (h @ p['Wp'].T + p['bp']).reshape(B, K, 2, 2)
    embx_r, embx_i = hf[:, :, 0, 0], hf[:, :, 0, 1]     # hx  (B, K)
    emby_r, emby_i = hf[:, :, 1, 0], hf[:, :, 1, 1]     # hy  (B, K)

    xc = jnp.transpose(x, (0, 3, 1, 2))                 # (B, I, M, N)

    # ---- rfft both directions, slice retained modes ----
    x_fty = jnp.fft.rfft(xc, axis=-1, norm='ortho')[..., :K]      # (B, I, M, K)
    x_ftx = jnp.fft.rfft(xc, axis=-2, norm='ortho')[:, :, :K, :]  # (B, I, K, N)

    # ---- pack both directions into one real-form batched matmul problem ----
    # z: (2, K, B, L, 2C) bf16, last dim = [Re | Im]   (single fused slab)
    zy = jnp.transpose(x_fty, (3, 0, 2, 1))             # (K, B, M, I) complex
    zx = jnp.transpose(x_ftx, (2, 0, 3, 1))             # (K, B, N, I) complex
    zc = jnp.stack([zy, zx], axis=0)                    # (2, K, B, L, I)
    z = jnp.concatenate([jnp.real(zc), jnp.imag(zc)], axis=-1).astype(jnp.bfloat16)

    # conditional embedding: just D*K*B complex scalars -> flat f32 array (SMEM)
    e_y = jnp.stack([emby_r, emby_i], axis=-1)          # (B, K, 2)  (y-dir uses hy)
    e_x = jnp.stack([embx_r, embx_i], axis=-1)          # (B, K, 2)  (x-dir uses hx)
    emb_flat = jnp.stack([e_y, e_x], axis=0).transpose(0, 2, 1, 3).reshape(-1)
    emb_flat = emb_flat.astype(jnp.float32)             # layout ((d*K+k)*B+b)*2 + {re,im}

    # fourier weights in real block form, f32 (scaled by emb + cast bf16 in-kernel)
    w0r = jnp.transpose(p['w0'][..., 0], (2, 0, 1))     # (K, I, O)
    w0i = jnp.transpose(p['w0'][..., 1], (2, 0, 1))
    w1r = jnp.transpose(p['w1'][..., 0], (2, 0, 1))
    w1i = jnp.transpose(p['w1'][..., 1], (2, 0, 1))
    wr = jnp.stack([w0r, w1r], axis=0)                  # (2, K, I, O)
    wi = jnp.stack([w0i, w1i], axis=0)
    wcat = jnp.concatenate([jnp.concatenate([wr, wi], axis=-1),
                            jnp.concatenate([-wi, wr], axis=-1)], axis=-2)   # (2,K,2I,2O)
    wrot = jnp.concatenate([jnp.concatenate([-wi, wr], axis=-1),
                            jnp.concatenate([-wr, -wi], axis=-1)], axis=-2)  # (2,K,2I,2O)

    o = spectral_mix(emb_flat, z, wcat, wrot)           # (2, K, B, L, 2O) bf16
    O = o.shape[-1] // 2
    oc = (o[..., :O].astype(jnp.float32)
          + 1j * o[..., O:].astype(jnp.float32))        # complex64 (2,K,B,L,O)

    # ---- scatter back into the spectrum and inverse FFT ----
    out_y = jnp.transpose(oc[0], (1, 3, 2, 0))                    # (B, O, M, K)
    out_ft_y = jnp.zeros((B, C, M, N // 2 + 1), jnp.complex64).at[..., :K].set(out_y)
    xy = jnp.fft.irfft(out_ft_y, n=N, axis=-1, norm='ortho')      # (B, O, M, N)

    out_x = jnp.transpose(oc[1], (1, 3, 0, 2))                    # (B, O, K, N)
    out_ft_x = jnp.zeros((B, C, M // 2 + 1, N), jnp.complex64).at[:, :, :K, :].set(out_x)
    xx = jnp.fft.irfft(out_ft_x, n=M, axis=-2, norm='ortho')      # (B, O, M, N)

    xf = jnp.transpose(xx + xy, (0, 2, 3, 1))                     # (B, M, N, C)

    # ---- backcast FF + dt scaling (Pallas, tiled over flattened spatial) ----
    dt_e = dt @ p['Wd'].T + p['bd']                               # (B, C)
    out = ff_scale(
        xf.reshape(B, M * N, C).astype(jnp.bfloat16),
        p['W1'].T.astype(jnp.bfloat16), p['b1'].reshape(1, -1),
        p['W2'].T.astype(jnp.bfloat16), p['b2'].reshape(1, -1),
        p['gamma'].reshape(1, -1), p['beta'].reshape(1, -1),
        dt_e.reshape(B, 1, C))
    # forward() returns (dt_emb * b, None); we return the tensor
    return out.reshape(B, M, N, C)
    # TODO(synk): 'low-pass' / 'no-fourier' modes not wired (only mode='full').


# --------------------------------------------------------------------------
# Pure-JAX reference (mirrors the torch code with complex einsums, f32)
# --------------------------------------------------------------------------
def reference_forward(x, dt, emb, p, n_modes):
    B, M, N, C = x.shape
    K = n_modes
    h = jax.nn.gelu(emb @ p['Wc'].T + p['bc'], approximate=False)
    hf = (h @ p['Wp'].T + p['bp']).reshape(B, K, 2, 2)
    embx = (hf[:, :, 0, 0] + 1j * hf[:, :, 0, 1])[:, None, :, None]   # (B,1,K,1)
    emby = (hf[:, :, 1, 0] + 1j * hf[:, :, 1, 1])[:, None, None, :]   # (B,1,1,K)
    xc = jnp.transpose(x, (0, 3, 1, 2))
    w0 = p['w0'][..., 0] + 1j * p['w0'][..., 1]
    w1 = p['w1'][..., 0] + 1j * p['w1'][..., 1]

    x_fty = jnp.fft.rfft(xc, axis=-1, norm='ortho')
    zy = emby * x_fty[..., :K]
    out_ft = jnp.zeros((B, C, M, N // 2 + 1), jnp.complex64)
    out_ft = out_ft.at[..., :K].set(jnp.einsum('bixy,ioy->boxy', zy, w0))
    xy = jnp.fft.irfft(out_ft, n=N, axis=-1, norm='ortho')

    x_ftx = jnp.fft.rfft(xc, axis=-2, norm='ortho')
    zx = embx * x_ftx[:, :, :K, :]
    out_ft = jnp.zeros((B, C, M // 2 + 1, N), jnp.complex64)
    out_ft = out_ft.at[:, :, :K, :].set(jnp.einsum('bixy,iox->boxy', zx, w1))
    xx = jnp.fft.irfft(out_ft, n=M, axis=-2, norm='ortho')

    xf = jnp.transpose(xx + xy, (0, 2, 3, 1))
    hh = jnp.maximum(xf @ p['W1'].T + p['b1'], 0.0)
    y = hh @ p['W2'].T + p['b2']
    mu = y.mean(-1, keepdims=True)
    var = ((y - mu) ** 2).mean(-1, keepdims=True)
    y = (y - mu) / jnp.sqrt(var + 1e-5) * p['gamma'] + p['beta']
    dt_e = (dt @ p['Wd'].T + p['bd'])[:, None, None, :]
    return dt_e * y


if __name__ == "__main__":
    B, M, N = 2, 16, 16
    in_dim = out_dim = 8
    cond_dim, n_modes, factor = 4, 4, 2

    key = jax.random.PRNGKey(0)
    kx, kdt, kemb, kparams = jax.random.split(key, 4)
    x = jax.random.normal(kx, (B, M, N, in_dim), jnp.float32)
    dt = jax.random.uniform(kdt, (B, 1), jnp.float32)
    emb = jax.random.normal(kemb, (B, cond_dim), jnp.float32)
    params = init_params(kparams, in_dim, out_dim, cond_dim, n_modes, factor)

    fwd = jax.jit(lambda x, dt, emb: spectral_conv2d_forward(x, dt, emb, params, n_modes))
    out = fwd(x, dt, emb)
    out = jax.block_until_ready(out)

    ref = jax.block_until_ready(reference_forward(x, dt, emb, params, n_modes))
    np.testing.assert_allclose(np.asarray(out), np.asarray(ref), rtol=2e-2, atol=2e-2)

    print("KERNEL_OK")
</pallas_src>

<mosaic_0001>
module attributes {stable_mosaic.version = 11 : i64} {
  func.func @_spectral_mix_kernel(%arg0: i32, %arg1: i32, %arg2: i32, %arg3: i32, %arg4: memref<32xf32, #tpu.memory_space<smem>>, %arg5: memref<1x1x1x16x16xbf16, #tpu.memory_space<vmem>>, %arg6: memref<1x1x16x16xf32, #tpu.memory_space<vmem>>, %arg7: memref<1x1x16x16xf32, #tpu.memory_space<vmem>>, %arg8: memref<1x1x1x16x16xbf16, #tpu.memory_space<vmem>>) attributes {dimension_semantics = [#tpu.dimension_semantics<parallel>, #tpu.dimension_semantics<parallel>, #tpu.dimension_semantics<parallel>, #tpu.dimension_semantics<parallel>], iteration_bounds = array<i64: 2, 4, 2, 1>, scalar_prefetch = 0 : i64, scratch_operands = 0 : i64, tpu.core_type = #tpu.core_type<tc>, window_params = [{transform_indices = @transform_0, window_bounds = array<i64: 32>}, {transform_indices = @transform_1, window_bounds = array<i64: 1, 1, 1, 16, 16>}, {transform_indices = @transform_2, window_bounds = array<i64: 1, 1, 16, 16>}, {transform_indices = @transform_3, window_bounds = array<i64: 1, 1, 16, 16>}, {transform_indices = @transform_4, window_bounds = array<i64: 1, 1, 1, 16, 16>}]} {
    %c4_i32 = arith.constant 4 : i32
    %0 = arith.muli %arg0, %c4_i32 : i32
    %1 = arith.addi %0, %arg1 : i32
    %c2_i32 = arith.constant 2 : i32
    %2 = arith.muli %1, %c2_i32 : i32
    %3 = arith.addi %2, %arg2 : i32
    %c2_i32_0 = arith.constant 2 : i32
    %4 = arith.muli %3, %c2_i32_0 : i32
    %5 = arith.index_cast %4 : i32 to index
    %6 = memref.load %arg4[%5] : memref<32xf32, #tpu.memory_space<smem>>
    %c1_i32 = arith.constant 1 : i32
    %7 = arith.addi %4, %c1_i32 : i32
    %8 = arith.index_cast %7 : i32 to index
    %9 = memref.load %arg4[%8] : memref<32xf32, #tpu.memory_space<smem>>
    %c0 = arith.constant 0 : index
    %c0_1 = arith.constant 0 : index
    %c0_2 = arith.constant 0 : index
    %c0_3 = arith.constant 0 : index
    %10 = vector.load %arg6[%c0, %c0_1, %c0_2, %c0_3] : memref<1x1x16x16xf32, #tpu.memory_space<vmem>>, vector<1x1x16x16xf32>
    %11 = vector.shape_cast %10 : vector<1x1x16x16xf32> to vector<16x16xf32>
    %12 = vector.broadcast %6 : f32 to vector<16x16xf32>
    %13 = arith.mulf %12, %11 : vector<16x16xf32>
    %c0_4 = arith.constant 0 : index
    %c0_5 = arith.constant 0 : index
    %c0_6 = arith.constant 0 : index
    %c0_7 = arith.constant 0 : index
    %14 = vector.load %arg7[%c0_4, %c0_5, %c0_6, %c0_7] : memref<1x1x16x16xf32, #tpu.memory_space<vmem>>, vector<1x1x16x16xf32>
    %15 = vector.shape_cast %14 : vector<1x1x16x16xf32> to vector<16x16xf32>
    %16 = vector.broadcast %9 : f32 to vector<16x16xf32>
    %17 = arith.mulf %16, %15 : vector<16x16xf32>
    %18 = arith.addf %13, %17 : vector<16x16xf32>
    %19 = arith.truncf %18 : vector<16x16xf32> to vector<16x16xbf16>
    %c0_8 = arith.constant 0 : index
    %c0_9 = arith.constant 0 : index
    %c0_10 = arith.constant 0 : index
    %c0_11 = arith.constant 0 : index
    %c0_12 = arith.constant 0 : index
    %20 = vector.load %arg5[%c0_8, %c0_9, %c0_10, %c0_11, %c0_12] : memref<1x1x1x16x16xbf16, #tpu.memory_space<vmem>>, vector<1x1x1x16x16xbf16>
    %21 = vector.shape_cast %20 : vector<1x1x1x16x16xbf16> to vector<16x16xbf16>
    %cst = arith.constant dense<0.000000e+00> : vector<16x16xf32>
    %22 = tpu.matmul %21, %19, %cst {dimension_numbers = #tpu.dot_dimension_numbers<[1], [0], [0], [1], [0, 0, 1, 1], [], []>} : vector<16x16xbf16>, vector<16x16xbf16>, vector<16x16xf32> -> vector<16x16xf32>
    %23 = arith.truncf %22 : vector<16x16xf32> to vector<16x16xbf16>
    %c0_13 = arith.constant 0 : index
    %c0_14 = arith.constant 0 : index
    %c0_15 = arith.constant 0 : index
    %c0_16 = arith.constant 0 : index
    %c0_17 = arith.constant 0 : index
    %24 = vector.load %arg8[%c0_13, %c0_14, %c0_15, %c0_16, %c0_17] : memref<1x1x1x16x16xbf16, #tpu.memory_space<vmem>>, vector<1x1x1x16x16xbf16>
    %25 = vector.shape_cast %24 : vector<1x1x1x16x16xbf16> to vector<16x16xbf16>
    %26 = vector.shape_cast %23 : vector<16x16xbf16> to vector<1x1x1x16x16xbf16>
    tpu.vector_store %arg8[%c0_13, %c0_14, %c0_15, %c0_16, %c0_17], %26 {strides = array<i32>} : memref<1x1x1x16x16xbf16, #tpu.memory_space<vmem>>, vector<1x1x1x16x16xbf16>,
    return
  }
  func.func @transform_0(%arg0: i32, %arg1: i32, %arg2: i32, %arg3: i32) -> i32 {
    %c0_i32 = arith.constant 0 : i32
    %c0_i32_0 = arith.constant 0 : i32
    return %c0_i32 : i32
  }
  func.func @transform_1(%arg0: i32, %arg1: i32, %arg2: i32, %arg3: i32) -> (i32, i32, i32, i32, i32) {
    %c0_i32 = arith.constant 0 : i32
    %c0_i32_0 = arith.constant 0 : i32
    return %arg0, %arg1, %arg2, %arg3, %c0_i32 : i32, i32, i32, i32, i32
  }
  func.func @transform_2(%arg0: i32, %arg1: i32, %arg2: i32, %arg3: i32) -> (i32, i32, i32, i32) {
    %c0_i32 = arith.constant 0 : i32
    %c0_i32_0 = arith.constant 0 : i32
    %c0_i32_1 = arith.constant 0 : i32
    return %arg0, %arg1, %c0_i32, %c0_i32_0 : i32, i32, i32, i32
  }
  func.func @transform_3(%arg0: i32, %arg1: i32, %arg2: i32, %arg3: i32) -> (i32, i32, i32, i32) {
    %c0_i32 = arith.constant 0 : i32
    %c0_i32_0 = arith.constant 0 : i32
    %c0_i32_1 = arith.constant 0 : i32
    return %arg0, %arg1, %c0_i32, %c0_i32_0 : i32, i32, i32, i32
  }
  func.func @transform_4(%arg0: i32, %arg1: i32, %arg2: i32, %arg3: i32) -> (i32, i32, i32, i32, i32) {
    %c0_i32 = arith.constant 0 : i32
    %c0_i32_0 = arith.constant 0 : i32
    return %arg0, %arg1, %arg2, %arg3, %c0_i32 : i32, i32, i32, i32, i32
  }
}

module attributes {stable_mosaic.version = 11 : i64} {
  func.func @_ff_scale_kernel(%arg0: i32, %arg1: i32, %arg2: memref<1x256x8xbf16, #tpu.memory_space<vmem>>, %arg3: memref<8x16xbf16, #tpu.memory_space<vmem>>, %arg4: memref<1x16xf32, #tpu.memory_space<vmem>>, %arg5: memref<16x8xbf16, #tpu.memory_space<vmem>>, %arg6: memref<1x8xf32, #tpu.memory_space<vmem>>, %arg7: memref<1x8xf32, #tpu.memory_space<vmem>>, %arg8: memref<1x8xf32, #tpu.memory_space<vmem>>, %arg9: memref<1x1x8xf32, #tpu.memory_space<vmem>>, %arg10: memref<1x256x8xf32, #tpu.memory_space<vmem>>) attributes {dimension_semantics = [#tpu.dimension_semantics<parallel>, #tpu.dimension_semantics<parallel>], iteration_bounds = array<i64: 2, 1>, scalar_prefetch = 0 : i64, scratch_operands = 0 : i64, tpu.core_type = #tpu.core_type<tc>, window_params = [{transform_indices = @transform_0, window_bounds = array<i64: 1, 256, 8>}, {pipeline_mode = #tpu.pipeline_mode<synchronous>, transform_indices = @transform_1, window_bounds = array<i64: 8, 16>}, {pipeline_mode = #tpu.pipeline_mode<synchronous>, transform_indices = @transform_2, window_bounds = array<i64: 1, 16>}, {pipeline_mode = #tpu.pipeline_mode<synchronous>, transform_indices = @transform_3, window_bounds = array<i64: 16, 8>}, {pipeline_mode = #tpu.pipeline_mode<synchronous>, transform_indices = @transform_4, window_bounds = array<i64: 1, 8>}, {pipeline_mode = #tpu.pipeline_mode<synchronous>, transform_indices = @transform_5, window_bounds = array<i64: 1, 8>}, {pipeline_mode = #tpu.pipeline_mode<synchronous>, transform_indices = @transform_6, window_bounds = array<i64: 1, 8>}, {transform_indices = @transform_7, window_bounds = array<i64: 1, 1, 8>}, {transform_indices = @transform_8, window_bounds = array<i64: 1, 256, 8>}]} {
    %c0 = arith.constant 0 : index
    %c0_0 = arith.constant 0 : index
    %c0_1 = arith.constant 0 : index
    %0 = vector.load %arg2[%c0, %c0_0, %c0_1] : memref<1x256x8xbf16, #tpu.memory_space<vmem>>, vector<1x256x8xbf16>
    %1 = vector.shape_cast %0 : vector<1x256x8xbf16> to vector<256x8xbf16>
    %c0_2 = arith.constant 0 : index
    %c0_3 = arith.constant 0 : index
    %2 = vector.load %arg3[%c0_2, %c0_3] : memref<8x16xbf16, #tpu.memory_space<vmem>>, vector<8x16xbf16>
    %cst = arith.constant dense<0.000000e+00> : vector<256x16xf32>
    %3 = tpu.matmul %1, %2, %cst {dimension_numbers = #tpu.dot_dimension_numbers<[1], [0], [0], [1], [0, 0, 1, 1], [], []>} : vector<256x8xbf16>, vector<8x16xbf16>, vector<256x16xf32> -> vector<256x16xf32>
    %c0_4 = arith.constant 0 : index
    %c0_5 = arith.constant 0 : index
    %4 = vector.load %arg4[%c0_4, %c0_5] : memref<1x16xf32, #tpu.memory_space<vmem>>, vector<1x16xf32>
    %5 = vector.broadcast %4 : vector<1x16xf32> to vector<256x16xf32>
    %6 = arith.addf %3, %5 : vector<256x16xf32>
    %cst_6 = arith.constant 0.000000e+00 : f32
    %7 = vector.broadcast %cst_6 : f32 to vector<256x16xf32>
    %8 = arith.maximumf %6, %7 : vector<256x16xf32>
    %9 = arith.truncf %8 : vector<256x16xf32> to vector<256x16xbf16>
    %c0_7 = arith.constant 0 : index
    %c0_8 = arith.constant 0 : index
    %10 = vector.load %arg5[%c0_7, %c0_8] : memref<16x8xbf16, #tpu.memory_space<vmem>>, vector<16x8xbf16>
    %cst_9 = arith.constant dense<0.000000e+00> : vector<256x8xf32>
    %11 = tpu.matmul %9, %10, %cst_9 {dimension_numbers = #tpu.dot_dimension_numbers<[1], [0], [0], [1], [0, 0, 1, 1], [], []>} : vector<256x16xbf16>, vector<16x8xbf16>, vector<256x8xf32> -> vector<256x8xf32>
    %c0_10 = arith.constant 0 : index
    %c0_11 = arith.constant 0 : index
    %12 = vector.load %arg6[%c0_10, %c0_11] : memref<1x8xf32, #tpu.memory_space<vmem>>, vector<1x8xf32>
    %13 = vector.broadcast %12 : vector<1x8xf32> to vector<256x8xf32>
    %14 = arith.addf %11, %13 : vector<256x8xf32>
    %cst_12 = arith.constant dense<0.000000e+00> : vector<256xf32>
    %15 = vector.multi_reduction <add>, %14, %cst_12 [1] : vector<256x8xf32> to vector<256xf32>
    %16 = vector.shape_cast %15 : vector<256xf32> to vector<256x1xf32>
    %cst_13 = arith.constant 8.000000e+00 : f32
    %17 = vector.broadcast %cst_13 : f32 to vector<256x1xf32>
    %18 = arith.divf %16, %17 : vector<256x1xf32>
    %19 = vector.broadcast %18 : vector<256x1xf32> to vector<256x8xf32>
    %20 = arith.subf %14, %19 : vector<256x8xf32>
    %21 = arith.mulf %20, %20 : vector<256x8xf32>
    %cst_14 = arith.constant dense<0.000000e+00> : vector<256xf32>
    %22 = vector.multi_reduction <add>, %21, %cst_14 [1] : vector<256x8xf32> to vector<256xf32>
    %23 = vector.shape_cast %22 : vector<256xf32> to vector<256x1xf32>
    %cst_15 = arith.constant 8.000000e+00 : f32
    %24 = vector.broadcast %cst_15 : f32 to vector<256x1xf32>
    %25 = arith.divf %23, %24 : vector<256x1xf32>
    %cst_16 = arith.constant 9.99999974E-6 : f32
    %26 = vector.broadcast %cst_16 : f32 to vector<256x1xf32>
    %27 = arith.addf %25, %26 : vector<256x1xf32>
    %28 = math.rsqrt %27 : vector<256x1xf32>
    %29 = vector.broadcast %28 : vector<256x1xf32> to vector<256x8xf32>
    %30 = arith.mulf %20, %29 : vector<256x8xf32>
    %c0_17 = arith.constant 0 : index
    %c0_18 = arith.constant 0 : index
    %31 = vector.load %arg7[%c0_17, %c0_18] : memref<1x8xf32, #tpu.memory_space<vmem>>, vector<1x8xf32>
    %32 = vector.broadcast %31 : vector<1x8xf32> to vector<256x8xf32>
    %33 = arith.mulf %30, %32 : vector<256x8xf32>
    %c0_19 = arith.constant 0 : index
    %c0_20 = arith.constant 0 : index
    %34 = vector.load %arg8[%c0_19, %c0_20] : memref<1x8xf32, #tpu.memory_space<vmem>>, vector<1x8xf32>
    %35 = vector.broadcast %34 : vector<1x8xf32> to vector<256x8xf32>
    %36 = arith.addf %33, %35 : vector<256x8xf32>
    %c0_21 = arith.constant 0 : index
    %c0_22 = arith.constant 0 : index
    %c0_23 = arith.constant 0 : index
    %37 = vector.load %arg9[%c0_21, %c0_22, %c0_23] : memref<1x1x8xf32, #tpu.memory_space<vmem>>, vector<1x1x8xf32>
    %38 = vector.shape_cast %37 : vector<1x1x8xf32> to vector<1x8xf32>
    %39 = vector.broadcast %38 : vector<1x8xf32> to vector<256x8xf32>
    %40 = arith.mulf %36, %39 : vector<256x8xf32>
    %c0_24 = arith.constant 0 : index
    %c0_25 = arith.constant 0 : index
    %c0_26 = arith.constant 0 : index
    %41 = vector.load %arg10[%c0_24, %c0_25, %c0_26] : memref<1x256x8xf32, #tpu.memory_space<vmem>>, vector<1x256x8xf32>
    %42 = vector.shape_cast %41 : vector<1x256x8xf32> to vector<256x8xf32>
    %43 = vector.shape_cast %40 : vector<256x8xf32> to vector<1x256x8xf32>
    tpu.vector_store %arg10[%c0_24, %c0_25, %c0_26], %43 {strides = array<i32>} : memref<1x256x8xf32, #tpu.memory_space<vmem>>, vector<1x256x8xf32>,
    return
  }
  func.func @transform_0(%arg0: i32, %arg1: i32) -> (i32, i32, i32) {
    %c0_i32 = arith.constant 0 : i32
    %c0_i32_0 = arith.constant 0 : i32
    return %arg0, %arg1, %c0_i32 : i32, i32, i32
  }
  func.func @transform_1(%arg0: i32, %arg1: i32) -> (i32, i32) {
    %c0_i32 = arith.constant 0 : i32
    %c0_i32_0 = arith.constant 0 : i32
    %c0_i32_1 = arith.constant 0 : i32
    return %c0_i32, %c0_i32_0 : i32, i32
  }
  func.func @transform_2(%arg0: i32, %arg1: i32) -> (i32, i32) {
    %c0_i32 = arith.constant 0 : i32
    %c0_i32_0 = arith.constant 0 : i32
    %c0_i32_1 = arith.constant 0 : i32
    return %c0_i32, %c0_i32_0 : i32, i32
  }
  func.func @transform_3(%arg0: i32, %arg1: i32) -> (i32, i32) {
    %c0_i32 = arith.constant 0 : i32
    %c0_i32_0 = arith.constant 0 : i32
    %c0_i32_1 = arith.constant 0 : i32
    return %c0_i32, %c0_i32_0 : i32, i32
  }
  func.func @transform_4(%arg0: i32, %arg1: i32) -> (i32, i32) {
    %c0_i32 = arith.constant 0 : i32
    %c0_i32_0 = arith.constant 0 : i32
    %c0_i32_1 = arith.constant 0 : i32
    return %c0_i32, %c0_i32_0 : i32, i32
  }
  func.func @transform_5(%arg0: i32, %arg1: i32) -> (i32, i32) {
    %c0_i32 = arith.constant 0 : i32
    %c0_i32_0 = arith.constant 0 : i32
    %c0_i32_1 = arith.constant 0 : i32
    return %c0_i32, %c0_i32_0 : i32, i32
  }
  func.func @transform_6(%arg0: i32, %arg1: i32) -> (i32, i32) {
    %c0_i32 = arith.constant 0 : i32
    %c0_i32_0 = arith.constant 0 : i32
    %c0_i32_1 = arith.constant 0 : i32
    return %c0_i32, %c0_i32_0 : i32, i32
  }
  func.func @transform_7(%arg0: i32, %arg1: i32) -> (i32, i32, i32) {
    %c0_i32 = arith.constant 0 : i32
    %c0_i32_0 = arith.constant 0 : i32
    %c0_i32_1 = arith.constant 0 : i32
    return %arg0, %c0_i32, %c0_i32_0 : i32, i32, i32
  }
  func.func @transform_8(%arg0: i32, %arg1: i32) -> (i32, i32, i32) {
    %c0_i32 = arith.constant 0 : i32
    %c0_i32_0 = arith.constant 0 : i32
    return %arg0, %arg1, %c0_i32 : i32, i32, i32
  }
}

</mosaic_0001>

<bundles_post_ra>
// kernel: reverse.6
= control target key start
LH: loop header
LB: loop body
LE: loop exit
PB: predicated region body
PF: predicated region fallthrough
CT: control target
= control target key end

     0   :  { %s344_s0 = inlined_call_operand.vmem [shape: f32[2,8,16,7], index: 0, kind: input, shape index: {}]   ;;  %s345_s1 = inlined_call_operand.vmem [shape: f32[2,8,16,7], index: 1, kind: output, shape index: {}]  }
   0x1   :  { %v112_v0 = vld [vmem:[%s344_s0 + $0xc0] sm:$0xff]  ;;  %v124_v7 = vld [vmem:[%s344_s0 + $0xd0] sm:$0xff]  ;;  %v138_v14 = vld [vmem:[%s344_s0 + $0xc8] sm:$0xff] }
   0x2   :  { %v113_v1 = vld [vmem:[%s344_s0 + $0xa0] sm:$0xff]  ;;  %4 = vst [vmem:[%s345_s1] sm:$0xff] %v112_v0  ;;  %v126_v8 = vld [vmem:[%s344_s0 + $0xb0] sm:$0xff]  ;;  %125 = vst [vmem:[%s345_s1 + $0x10] sm:$0xff] %v124_v7 }
   0x3   :  { %v115_v2 = vld [vmem:[%s344_s0 + $0x80] sm:$0xff]  ;;  %114 = vst [vmem:[%s345_s1 + $0x20] sm:$0xff] %v113_v1  ;;  %127 = vst [vmem:[%s345_s1 + $0x30] sm:$0xff] %v126_v8  ;;  %v128_v9 = vld [vmem:[%s344_s0 + $0x90] sm:$0xff] }
   0x4   :  { %116 = vst [vmem:[%s345_s1 + $0x40] sm:$0xff] %v115_v2  ;;  %v117_v3 = vld [vmem:[%s344_s0 + $0x60] sm:$0xff]  ;;  %v130_v10 = vld [vmem:[%s344_s0 + $0x70] sm:$0xff]  ;;  %129 = vst [vmem:[%s345_s1 + $0x50] sm:$0xff] %v128_v9 }
   0x5   :  { %v119_v4 = vld [vmem:[%s344_s0 + $0x40] sm:$0xff]  ;;  %118 = vst [vmem:[%s345_s1 + $0x60] sm:$0xff] %v117_v3  ;;  %v132_v11 = vld [vmem:[%s344_s0 + $0x50] sm:$0xff]  ;;  %131 = vst [vmem:[%s345_s1 + $0x70] sm:$0xff] %v130_v10 }
   0x6   :  { %v121_v5 = vld [vmem:[%s344_s0 + $0x20] sm:$0xff]  ;;  %120 = vst [vmem:[%s345_s1 + $0x80] sm:$0xff] %v119_v4  ;;  %133 = vst [vmem:[%s345_s1 + $0x90] sm:$0xff] %v132_v11  ;;  %v134_v12 = vld [vmem:[%s344_s0 + $0x30] sm:$0xff] }
   0x7   :  { %122 = vst [vmem:[%s345_s1 + $0xa0] sm:$0xff] %v121_v5  ;;  %v25_v6 = vld [vmem:[%s344_s0] sm:$0xff]  ;;  %v136_v13 = vld [vmem:[%s344_s0 + $0x10] sm:$0xff]  ;;  %135 = vst [vmem:[%s345_s1 + $0xb0] sm:$0xff] %v134_v12 }
   0x8   :  { %123 = vst [vmem:[%s345_s1 + $0xc0] sm:$0xff] %v25_v6  ;;  %137 = vst [vmem:[%s345_s1 + $0xd0] sm:$0xff] %v136_v13  ;;  %v140_v15 = vld [vmem:[%s344_s0 + $0xa8] sm:$0xff]  ;;  %v152_v21 = vld [vmem:[%s344_s0 + $0xd8] sm:$0xff] }
   0x9   :  { %139 = vst [vmem:[%s345_s1 + $0x8] sm:$0xff] %v138_v14  ;;  %v142_v16 = vld [vmem:[%s344_s0 + $0x88] sm:$0xff]  ;;  %141 = vst [vmem:[%s345_s1 + $0x28] sm:$0xff] %v140_v15  ;;  %v154_v22 = vld [vmem:[%s344_s0 + $0xb8] sm:$0xff] }
   0xa   :  { %v144_v17 = vld [vmem:[%s344_s0 + $0x68] sm:$0xff]  ;;  %143 = vst [vmem:[%s345_s1 + $0x48] sm:$0xff] %v142_v16  ;;  %v156_v23 = vld [vmem:[%s344_s0 + $0x98] sm:$0xff]  ;;  %153 = vst [vmem:[%s345_s1 + $0x18] sm:$0xff] %v152_v21 }
   0xb   :  { %145 = vst [vmem:[%s345_s1 + $0x68] sm:$0xff] %v144_v17  ;;  %v146_v18 = vld [vmem:[%s344_s0 + $0x48] sm:$0xff]  ;;  %155 = vst [vmem:[%s345_s1 + $0x38] sm:$0xff] %v154_v22  ;;  %v158_v24 = vld [vmem:[%s344_s0 + $0x78] sm:$0xff] }
   0xc   :  { %v148_v19 = vld [vmem:[%s344_s0 + $0x28] sm:$0xff]  ;;  %147 = vst [vmem:[%s345_s1 + $0x88] sm:$0xff] %v146_v18  ;;  %157 = vst [vmem:[%s345_s1 + $0x58] sm:$0xff] %v156_v23  ;;  %v160_v25 = vld [vmem:[%s344_s0 + $0x58] sm:$0xff] }
   0xd   :  { %v150_v20 = vld [vmem:[%s344_s0 + $0x8] sm:$0xff]  ;;  %149 = vst [vmem:[%s345_s1 + $0xa8] sm:$0xff] %v148_v19  ;;  %v162_v26 = vld [vmem:[%s344_s0 + $0x38] sm:$0xff]  ;;  %159 = vst [vmem:[%s345_s1 + $0x78] sm:$0xff] %v158_v24 }
   0xe   :  { %151 = vst [vmem:[%s345_s1 + $0xc8] sm:$0xff] %v150_v20  ;;  %161 = vst [vmem:[%s345_s1 + $0x98] sm:$0xff] %v160_v25  ;;  %v164_v27 = vld [vmem:[%s344_s0 + $0x18] sm:$0xff] }
   0xf   :  { %163 = vst [vmem:[%s345_s1 + $0xb8] sm:$0xff] %v162_v26  ;;  %165 = vst [vmem:[%s345_s1 + $0xd8] sm:$0xff] %v164_v27 }

// kernel: _lambda_.2
= control target key start
LH: loop header
LB: loop body
LE: loop exit
PB: predicated region body
PF: predicated region fallthrough
CT: control target
= control target key end

     0   :  { %s990_s0 = inlined_call_operand.vmem [shape: f32[32], index: 0, kind: input, shape index: {}]   ;;  %s991_s1 = inlined_call_operand.vmem [shape: bf16[2,4,2,16,16], index: 1, kind: input, shape index: {}]   ;;  %s992_s2 = inlined_call_operand.vmem [shape: f32[2,4,16,16], index: 2, kind: input, shape index: {}]   ;;  %s993_s3 = inlined_call_operand.vmem [shape: f32[2,4,16,16], index: 3, kind: input, shape index: {}]   ;;  %s994_s4 = inlined_call_operand.vmem [shape: bf16[2,4,2,16,16], index: 4, kind: output, shape index: {}]  }
   0x1   :  { %995 = sst [smem:[#allocation8_spill]] %s990_s0 }
   0x2   :  { %9 = vsyncpa [#allocation3], 0  ;;  %s876_s15 = smov 0   ;;  %s878_s16 = smov 0  }
   0x3   :  { %s880_s17 = smov 0   ;;  %s882_s18 = smov 0  }
   0x4   :  { %s884_s19 = smov 0   ;;  %s886_s20 = smov 0  }
   0x5   :  { %s888_s21 = smov 0  }
   0x6 LB: > { %s663_s22 = sadd.s32 4294967295, %s846_s21   ;;  %s33_s23 = sadd.s32 1, %s834_s18  ;;  %s846_s21 = sphi %s888_s21, %s15_s21   ;;  %s842_s20 = sphi %s886_s20, %s1010_s20   ;;  %s838_s19 = sphi %s884_s19, %s1009_s19   ;;  %s834_s18 = sphi %s882_s18, %s1008_s18   ;;  %s830_s17 = sphi %s880_s17, %s1007_s17   ;;  %s826_s16 = sphi %s878_s16, %s1006_s16   ;;  %s822_s15 = sphi %s876_s15, %s1005_s15  }
   0x7   : > { %p35_p0 = scmp.ge.s32.totalorder %s33_s23, 2  ;;  %s37_s24 = sadd.s32 1, %s838_s19 }
   0x8   : > { %s41_s25 = sadd.s32 1, %s842_s20  ;;  %p665_p1 = scmp.ge.s32.totalorder %s846_s21, 1 }
   0x9   : > { %s1012_s23 = smov (%p35_p0, %s33_s23), 0  ;;  %s1014_s24 = smov (!%p35_p0, %s37_s24), %s838_s19 }
   0xa   : > { %996 = sst [smem:[#allocation5_spill]] %s1012_s23  ;;  %p187_p2 = scmp.lt.s32.totalorder %s846_s21, 17 }
   0xb   : > { %p39_p3 = scmp.ge.s32.totalorder %s1014_s24, 4  ;;  %p920_p4 = scmp.eq.s32.totalorder %s663_s22, 0 }
   0xc   : > { %p924_p5 = pnand %p665_p1, %p187_p2  ;;  %s999_s0 = sld [smem:[#allocation8_spill]] }
   0xd   : > { %s1016_s24 = smov (%p39_p3, %s1014_s24), 0  ;;  %s1018_s25 = smov (!%p39_p3, %s41_s25), %s842_s20 }
   0xe   : > { %1000 = sst [smem:[#allocation6_spill]] %s1016_s24  ;;  %p707_p6 = pneg %p924_p5 }
   0xf   : > { %p43_p7 = scmp.ge.s32.totalorder %s1018_s25, 2 }
  0x10   : > { %p708_p8 = pnand %p920_p4, %p707_p6 }
  0x11   : > { %s1020_s25 = smov (%p43_p7, %s1018_s25), 0 }
  0x12   : > { %s200_s30 = sshll.u32 %s999_s0, 4  ;;  %1001 = sst [smem:[#allocation7_spill]] %s1020_s25  ;;  %s201_s30 = int_to_ptr.vmem [resolvable:$true] %s200_s30 }
  0x13   : > { %s773_s5 = scalar_lea.vmem %s201_s30, 16  ;;  %p775_p10 = pneg %p708_p8 }
  0x14   : > { %p774_p9 = scmp.ne.s32.totalorder %s201_s30, %s773_s5  ;;  %p781_p13 = scmp.lt.s32.totalorder %s201_s30, %s201_s30 }
  0x15   : > { %p782_p0 = scmp.lt.s32.totalorder %s773_s5, %s773_s5 }
  0x16   : > { %p776_p11 = pnand %p775_p10, %p774_p9 }
  0x17   : > { %p783_p1 = por %p782_p0, %p781_p13 }
  0x18   : > { %p777_p12 = pneg %p776_p11 }
  0x1a   : > { %p784_p2 = pnand %p783_p1, %p777_p12 }
  0x1c   : > { %787 = shalt.err (!%p784_p2)
}
  0x1d   : > { %s848_s6 = smov [#allocation2]   ;;  %258 = sbr.rel (%p924_p5) target bundleno = 263 (0x107), region = 36 }
  0x1e   : > { %710 = dma.vmem_to_smem (!%p708_p8), %s201_s30, 16, %s848_s6, [#allocation3]  }
  0x22   : > { %817 = dma.done.wait (%p920_p4), [#allocation3], 16  }
  0x23   : > { %819 = vsyncadd (%p920_p4), [#allocation3], 4294967280 }
  0x24   : > { %264 = sfence }
  0x25   : > { %p328_p3 = scmp.lt.s32.totalorder %s830_s17, 1  ;;  %p330_p6 = scmp.lt.s32.totalorder %s826_s16, 3  ;;  %v849_v0 = vmov 0.0   ;;  %vm850_vm0 = vmmov 0   ;;  %vm410_vm1 = vcmask 130048   ;;  %vm463_vm2 = vcmask 125952  }
  0x26   : > { %697 = vmatprep.subr.bf16.mxu0 %v849_v0  ;;  %s684_s7 = sshll.u32 %s830_s17, 2  ;;  %699 = vmatprep.mubr.msk.bf16.mxu0 %vm850_vm0, %v849_v0  ;;  %p332_p5 = scmp.lt.s32.totalorder %s822_s15, 1 }
  0x27   : > { %s1022_s17 = smov (!%p328_p3, %s830_s17), 1  ;;  %s383_s10 = sadd.s32 %s826_s16, %s684_s7 }
  0x28   : > { %s331_s8 = scalar_select %p330_p6, %s826_s16, 3 }
  0x29   : > { %s675_s9 = sshll.u32 %s1022_s17, 3  ;;  %s685_s12 = sshll.u32 %s383_s10, 1 }
  0x2a   : > { %s674_s11 = sshll.u32 %s331_s8, 1  ;;  %s385_s14 = sadd.s32 %s822_s15, %s685_s12 }
  0x2b   : > { %s351_s13 = sadd.s32 %s675_s9, %s674_s11  ;;  %s686_s26 = sshll.u32 %s385_s14, 1 }
  0x2c   : > { %s676_s22 = sshll.u32 %s351_s13, 3  ;;  %s387_s0 = sld [smem:[#allocation2 + %s686_s26]] }
  0x2d   : > { %s353_s29 = scalar_lea.vmem %s992_s2, %s676_s22  ;;  %s362_s6 = scalar_lea.vmem %s993_s3, %s676_s22 }
  0x2e   : > { %s388_s25 = sadd.s32 1, %s686_s26  ;;  %s671_s23 = sshll.u32 %s331_s8, 2  ;;  %v390_v1 = vld [vmem:[%s353_s29] sm:$0xff]  ;;  %v391_v2 = vld [vmem:[%s353_s29 + $0x8] sm:$0xff] }
  0x2f   : > { %s389_s24 = sld [smem:[#allocation2 + %s388_s25]]  ;;  %s1024_s15 = smov (!%p332_p5, %s822_s15), 1  ;;  %v395_v3 = vld [vmem:[%s362_s6] sm:$0xff]  ;;  %v396_v4 = vld [vmem:[%s362_s6 + $0x8] sm:$0xff] }
  0x30   : > { %s672_s16 = sshll.u32 %s1022_s17, 4  ;;  %s670_s7 = sshll.u32 %s1024_s15, 1 }
  0x31   : > { %s339_s9 = sadd.s32 %s671_s23, %s670_s7 }
  0x32   : > { %v392_v5 = vstv %s387_s0  ;;  %s341_s10 = sadd.s32 %s672_s16, %s339_s9 }
  0x33   : > { %v393_v6 = vmul.f32 %v392_v5, %v390_v1  ;;  %v394_v7 = vmul.f32 %v392_v5, %v391_v2  ;;  %s673_s11 = sshll.u32 %s341_s10, 2 }
  0x34   : > { %s343_s8 = scalar_lea.vmem %s991_s1, %s673_s11  ;;  %s379_s17 = scalar_lea.vmem %s994_s4, %s673_s11 }
  0x35   : > { %v397_v8 = vstv %s389_s24  ;;  %v772_v14 = vld [vmem:[%s343_s8] sm:$0xff]  }
  0x36   : > { %v398_v9 = vmul.f32 %v397_v8, %v395_v3  ;;  %v399_v10 = vmul.f32 %v397_v8, %v396_v4 }
  0x38   : > { %v400_v11 = vadd.f32 %v398_v9, %v393_v6  ;;  %v401_v12 = vadd.f32 %v399_v10, %v394_v7 }
  0x3a   : > { %v402_v13 = vpack.c.bf16 %v401_v12, %v400_v11 }
  0x3c   : > { %698 = vmatpush3.bf16.msra.mxu0 %v402_v13 }
  0x3f   : > { %700 = vmatmul.mubr.msk.bf16.vlgmr.msra.gmra.mxu0 %vm410_vm1, %v772_v14 }
  0xff   : > { %v448_v15 = vpop.f32.mrf.mxu0 }
 0x100   : > { %v693_v16 = vpack.c.bf16 %v448_v15, %v448_v15 }
 0x101   : > { %v701_v17 = vpop.f32.mrf.mxu0 }
 0x102   : > { %464 = vst.msk [vmem:[%s379_s17] sm:$0xf] %vm463_vm2, %v693_v16 }
 0x103   : > { %v451_v18 = vpop.f32.mrf.mxu0 }
 0x104   : > { %v694_v19 = vpack.c.bf16 %v451_v18, %v451_v18 }
 0x105   : > { %v702_v20 = vpop.f32.mrf.mxu0 }
 0x106   : > { %465 = vst.msk [vmem:[%s379_s17 + $0x4] sm:$0xf] %vm463_vm2, %v694_v19 }
 0x107 PF: > { %s15_s21 = sadd.s32 1, %s846_s21   ;;  %s1002_s23 = sld [smem:[#allocation5_spill]] }
 0x108   : > { %p12_p4 = scmp.ge.s32.totalorder %s15_s21, 18   ;;  %s1003_s24 = sld [smem:[#allocation6_spill]] }
 0x109   : > { %s1004_s13 = sld [smem:[#allocation7_spill]]  ;;  %s1005_s15 = smov %s834_s18 }
 0x10a   : > { %s1006_s16 = smov %s838_s19  ;;  %s1007_s17 = smov %s842_s20 }
 0x10b   :  { %14 = sbr.rel (!%p12_p4) target bundleno = 6 (0x6), region = 77 }
 0x10d   : > { %s1008_s18 = smov %s1002_s23 }
 0x10e   : > { %s1009_s19 = smov %s1003_s24 }
 0x10f   : > { %s1010_s20 = smov %s1004_s13 }
 0x110   :  { %512 = vsyncpa [#allocation3], 1 }
 0x111   :  { %514 = vsyncpa [#allocation3 + $0x1], 1 }

// kernel: _lambda_.3
= control target key start
LH: loop header
LB: loop body
LE: loop exit
PB: predicated region body
PF: predicated region fallthrough
CT: control target
= control target key end

     0   :  { %s1973_s27 = smov 0   ;;  %s1975_s28 = smov 0   ;;  %s2670_s0 = inlined_call_operand.vmem [shape: bf16[2,256,8], index: 0, kind: input, shape index: {}]   ;;  %s2671_s1 = inlined_call_operand.vmem [shape: bf16[8,16], index: 1, kind: input, shape index: {}]   ;;  %s2672_s2 = inlined_call_operand.vmem [shape: f32[1,16], index: 2, kind: input, shape index: {}]   ;;  %s2673_s3 = inlined_call_operand.vmem [shape: bf16[16,8], index: 3, kind: input, shape index: {}]   ;;  %s2674_s4 = inlined_call_operand.vmem [shape: f32[1,8], index: 4, kind: input, shape index: {}, may-alias: {4,6}]   ;;  %s2675_s5 = inlined_call_operand.vmem [shape: f32[1,8], index: 5, kind: input, shape index: {}]   ;;  %s2676_s6 = inlined_call_operand.vmem [shape: f32[1,8], index: 6, kind: input, shape index: {}, may-alias: {4,6}]   ;;  %s2677_s7 = inlined_call_operand.vmem [shape: f32[2,1,8], index: 7, kind: input, shape index: {}]   ;;  %s2678_s8 = inlined_call_operand.vmem [shape: f32[2,256,8], index: 8, kind: output, shape index: {}]  }
   0x1   :  { %s1977_s29 = smov 0  }
   0x2 LB: > { %s30_s30 = sadd.s32 1, %s1922_s28  ;;  %p1633_p0 = scmp.ge.s32.totalorder %s1926_s29, 1  ;;  %s1926_s29 = sphi %s1977_s29, %s18_s29   ;;  %s1922_s28 = sphi %s1975_s28, %s2680_s28   ;;  %s1918_s27 = sphi %s1973_s27, %s2679_s27  }
   0x3   : > { %p32_p1 = scmp.ge.s32.totalorder %s30_s30, 2  ;;  %p291_p2 = scmp.lt.s32.totalorder %s1926_s29, 3 }
   0x5   : > { %s2682_s30 = smov (%p32_p1, %s30_s30), 0  ;;  %p292_p3 = pnand %p1633_p0, %p291_p2 }
   0x6   : > { %p337_p4 = scmp.lt.s32.totalorder (!%p292_p3), %s1918_s27, 1 }
   0x7   : > { %295 = sbr.rel (%p292_p3) target bundleno = 796 (0x31c), region = 52 }
   0xc   : > { %v392_v0 = vld [vmem:[%s2671_s1] sm:$0xf]  ;;  %vm529_vm0 = vcmask 1043456   ;;  %s2684_s27 = smov (!%p337_p4, %s1918_s27), 1  ;;  %vm480_vm1 = vcmask 64512   ;;  %vm757_vm2 = vcmask 130048  }
   0xd   : > { %1798 = vmatprep.subr.msk.bf16.mxu0 %vm529_vm0, %v392_v0  ;;  %v531_v1 = vsel %vm529_vm0, %v392_v0, 0  ;;  %s1694_s11 = sshll.u32 %s2684_s27, 7  ;;  %v1839_v18 = vld [vmem:[%s2673_s3] sm:$0xff]   ;;  %s348_s25 = scalar_lea.vmem %s2677_s7, %s2684_s27 }
   0xe   : > { %1731 = vmatpush3.bf16.msra.mxu0 %v531_v1  ;;  %s2000_s14 = scalar_lea.vmem %s2670_s0, %s1694_s11  ;;  %1764 = vmatprep.subr.bf16.mxu1 %v1839_v18  ;;  %v2040_v21 = vld [vmem:[%s2672_s2] ss:$0 sm:$0xff]  ;;  %s1695_s10 = sshll.u32 %s2684_s27, 8 }
   0xf   : > { %v1823_v2 = vld [vmem:[%s2000_s14] sm:$0xff]   ;;  %v1824_v3 = vld [vmem:[%s2000_s14 + $0x8] sm:$0xff]   ;;  %v1825_v4 = vld [vmem:[%s2000_s14 + $0x10] sm:$0xff]   ;;  %1765 = vmatpush3.bf16.msra.mxu1 %v1839_v18  ;;  %s2471_s27 = scalar_lea.vmem %s2678_s8, %s1695_s10 }
  0x10   : > { %1732 = vmatprep.mubr.msk.bf16.mxu0 %vm480_vm1, %v1823_v2  ;;  %v1826_v5 = vld [vmem:[%s2000_s14 + $0x18] sm:$0xff]   ;;  %v1827_v6 = vld [vmem:[%s2000_s14 + $0x20] sm:$0xff]   ;;  %v1828_v7 = vld [vmem:[%s2000_s14 + $0x28] sm:$0xff]  }
  0x11   : > { %1733 = vmatmul.mubr.msk.bf16.vlgmr.msra.gmra.mxu0 %vm480_vm1, %v1824_v3  ;;  %v1829_v8 = vld [vmem:[%s2000_s14 + $0x30] sm:$0xff]   ;;  %v1830_v9 = vld [vmem:[%s2000_s14 + $0x38] sm:$0xff]   ;;  %v1831_v10 = vld [vmem:[%s2000_s14 + $0x40] sm:$0xff]  }
  0x12   : > { %1736 = vmatprep.mubr.msk.bf16.mxu0 %vm480_vm1, %v1825_v4  ;;  %v1832_v11 = vld [vmem:[%s2000_s14 + $0x48] sm:$0xff]   ;;  %v1833_v12 = vld [vmem:[%s2000_s14 + $0x50] sm:$0xff]   ;;  %v1834_v13 = vld [vmem:[%s2000_s14 + $0x58] sm:$0xff]  }
  0x13   : > { %v1835_v14 = vld [vmem:[%s2000_s14 + $0x60] sm:$0xff]   ;;  %v1836_v15 = vld [vmem:[%s2000_s14 + $0x68] sm:$0xff]   ;;  %v1837_v16 = vld [vmem:[%s2000_s14 + $0x70] sm:$0xff]  }
  0x14   : > { %v1838_v17 = vld [vmem:[%s2000_s14 + $0x78] sm:$0xff]  }
  0x19   : > { %1737 = vmatmul.mubr.msk.bf16.gmra.mxu0 %vm480_vm1, %v1826_v5 }
  0x1a   : > { %1740 = vmatprep.mubr.msk.bf16.mxu0 %vm480_vm1, %v1827_v6 }
  0x21   : > { %1741 = vmatmul.mubr.msk.bf16.gmra.mxu0 %vm480_vm1, %v1828_v7 }
  0x22   : > { %1744 = vmatprep.mubr.msk.bf16.mxu0 %vm480_vm1, %v1829_v8 }
  0x29   : > { %1745 = vmatmul.mubr.msk.bf16.gmra.mxu0 %vm480_vm1, %v1830_v9 }
  0x2a   : > { %1748 = vmatprep.mubr.msk.bf16.mxu0 %vm480_vm1, %v1831_v10 }
  0x31   : > { %1749 = vmatmul.mubr.msk.bf16.gmra.mxu0 %vm480_vm1, %v1832_v11 }
  0x32   : > { %1752 = vmatprep.mubr.msk.bf16.mxu0 %vm480_vm1, %v1833_v12 }
  0x39   : > { %1753 = vmatmul.mubr.msk.bf16.gmra.mxu0 %vm480_vm1, %v1834_v13 }
  0x3a   : > { %1756 = vmatprep.mubr.msk.bf16.mxu0 %vm480_vm1, %v1835_v14 }
  0x41   : > { %1757 = vmatmul.mubr.msk.bf16.gmra.mxu0 %vm480_vm1, %v1836_v15 }
  0x42   : > { %1760 = vmatprep.mubr.msk.bf16.mxu0 %vm480_vm1, %v1837_v16 }
  0x49   : > { %1761 = vmatmul.mubr.msk.bf16.gmra.mxu0 %vm480_vm1, %v1838_v17 }
  0xd1   : > { %v1734_v19 = vpop.f32.mrf.mxu0 }
  0xd2   : > { %v576_v25 = vadd.f32 %v1734_v19, %v2040_v21 }
  0xd3   : > { %v567_v20 = vpop.f32.mrf.mxu0 }
  0xd4   : > { %v568_v23 = vadd.f32 %v2040_v21, %v567_v20  ;;  %v696_v32 = vmax.f32 %v576_v25, 0.0 }
  0xd5   : > { %v1735_v22 = vpop.f32.mrf.mxu0 }
  0xd6   : > { %v579_v24 = vadd.f32 %v1735_v22, %v2040_v21  ;;  %v694_v30 = vmax.f32 %v568_v23, 0.0 }
  0xd7   : > { %v570_v26 = vpop.f32.mrf.mxu0 }
  0xd8   : > { %v571_v27 = vadd.f32 %v2040_v21, %v570_v26  ;;  %v697_v28 = vmax.f32 %v579_v24, 0.0 }
  0xd9   : > { %v1738_v29 = vpop.f32.mrf.mxu0 }
  0xda   : > { %v695_v31 = vmax.f32 %v571_v27, 0.0  ;;  %v727_v35 = vpack.c.bf16 %v697_v28, %v696_v32  ;;  %v592_v39 = vadd.f32 %v1738_v29, %v2040_v21 }
  0xdb   : > { %v583_v33 = vpop.f32.mrf.mxu0 }
  0xdc   : > { %v726_v34 = vpack.c.bf16 %v695_v31, %v694_v30  ;;  %v584_v37 = vadd.f32 %v2040_v21, %v583_v33  ;;  %v700_v46 = vmax.f32 %v592_v39, 0.0 }
  0xdd   : > { %v1739_v36 = vpop.f32.mrf.mxu0 }
  0xde   : > { %v595_v38 = vadd.f32 %v1739_v36, %v2040_v21  ;;  %1766 = vmatprep.mubr.msk.bf16.mxu1 %vm757_vm2, %v726_v34  ;;  %v698_v44 = vmax.f32 %v584_v37, 0.0 }
  0xdf   : > { %v586_v40 = vpop.f32.mrf.mxu0  ;;  %1767 = vmatmul.mubr.msk.bf16.vlgmr.msra.gmra.mxu1 %vm757_vm2, %v727_v35 }
  0xe0   : > { %v587_v41 = vadd.f32 %v2040_v21, %v586_v40  ;;  %v701_v42 = vmax.f32 %v595_v38, 0.0 }
  0xe1   : > { %v1742_v43 = vpop.f32.mrf.mxu0 }
  0xe2   : > { %v699_v45 = vmax.f32 %v587_v41, 0.0  ;;  %v729_v49 = vpack.c.bf16 %v701_v42, %v700_v46  ;;  %v608_v53 = vadd.f32 %v1742_v43, %v2040_v21 }
  0xe3   : > { %v599_v47 = vpop.f32.mrf.mxu0 }
  0xe4   : > { %v728_v48 = vpack.c.bf16 %v699_v45, %v698_v44  ;;  %v600_v51 = vadd.f32 %v2040_v21, %v599_v47  ;;  %v704_v60 = vmax.f32 %v608_v53, 0.0 }
  0xe5   : > { %v1743_v50 = vpop.f32.mrf.mxu0 }
  0xe6   : > { %v611_v52 = vadd.f32 %v1743_v50, %v2040_v21  ;;  %1770 = vmatprep.mubr.msk.bf16.mxu1 %vm757_vm2, %v728_v48  ;;  %v702_v58 = vmax.f32 %v600_v51, 0.0 }
  0xe7   : > { %v602_v54 = vpop.f32.mrf.mxu0  ;;  %1771 = vmatmul.mubr.msk.bf16.gmra.mxu1 %vm757_vm2, %v729_v49 }
  0xe8   : > { %v603_v55 = vadd.f32 %v2040_v21, %v602_v54  ;;  %v705_v56 = vmax.f32 %v611_v52, 0.0 }
  0xe9   : > { %v1746_v57 = vpop.f32.mrf.mxu0 }
  0xea   : > { %v703_v59 = vmax.f32 %v603_v55, 0.0  ;;  %v731_v63 = vpack.c.bf16 %v705_v56, %v704_v60  ;;  %v624_v3 = vadd.f32 %v1746_v57, %v2040_v21 }
  0xeb   : > { %v615_v61 = vpop.f32.mrf.mxu0 }
  0xec   : > { %v730_v62 = vpack.c.bf16 %v703_v59, %v702_v58  ;;  %v616_v1 = vadd.f32 %v2040_v21, %v615_v61  ;;  %v708_v10 = vmax.f32 %v624_v3, 0.0 }
  0xed   : > { %v1747_v0 = vpop.f32.mrf.mxu0 }
  0xee   : > { %v627_v2 = vadd.f32 %v1747_v0, %v2040_v21  ;;  %1774 = vmatprep.mubr.msk.bf16.mxu1 %vm757_vm2, %v730_v62  ;;  %v706_v8 = vmax.f32 %v616_v1, 0.0 }
  0xef   : > { %v618_v4 = vpop.f32.mrf.mxu0  ;;  %1775 = vmatmul.mubr.msk.bf16.gmra.mxu1 %vm757_vm2, %v731_v63 }
  0xf0   : > { %v619_v5 = vadd.f32 %v2040_v21, %v618_v4  ;;  %v709_v6 = vmax.f32 %v627_v2, 0.0 }
  0xf1   : > { %v1750_v7 = vpop.f32.mrf.mxu0 }
  0xf2   : > { %v707_v9 = vmax.f32 %v619_v5, 0.0  ;;  %v733_v13 = vpack.c.bf16 %v709_v6, %v708_v10  ;;  %v640_v17 = vadd.f32 %v1750_v7, %v2040_v21  ;;  %v2093_v5 = vld [vmem:[%s2674_s4] ss:$0 sm:$0xff] }
  0xf3   : > { %v631_v11 = vpop.f32.mrf.mxu0 }
  0xf4   : > { %v732_v12 = vpack.c.bf16 %v707_v9, %v706_v8  ;;  %v632_v15 = vadd.f32 %v2040_v21, %v631_v11  ;;  %v712_v25 = vmax.f32 %v640_v17, 0.0 }
  0xf5   : > { %v1751_v14 = vpop.f32.mrf.mxu0 }
  0xf6   : > { %v643_v16 = vadd.f32 %v1751_v14, %v2040_v21  ;;  %1778 = vmatprep.mubr.msk.bf16.mxu1 %vm757_vm2, %v732_v12  ;;  %v710_v23 = vmax.f32 %v632_v15, 0.0 }
  0xf7   : > { %v634_v18 = vpop.f32.mrf.mxu0  ;;  %1779 = vmatmul.mubr.msk.bf16.gmra.mxu1 %vm757_vm2, %v733_v13 }
  0xf8   : > { %v635_v19 = vadd.f32 %v2040_v21, %v634_v18  ;;  %v713_v20 = vmax.f32 %v643_v16, 0.0 }
  0xf9   : > { %v1754_v22 = vpop.f32.mrf.mxu0 }
  0xfa   : > { %v711_v24 = vmax.f32 %v635_v19, 0.0  ;;  %v735_v28 = vpack.c.bf16 %v713_v20, %v712_v25  ;;  %v656_v32 = vadd.f32 %v1754_v22, %v2040_v21 }
  0xfb   : > { %v647_v26 = vpop.f32.mrf.mxu0 }
  0xfc   : > { %v734_v27 = vpack.c.bf16 %v711_v24, %v710_v23  ;;  %v648_v30 = vadd.f32 %v2040_v21, %v647_v26  ;;  %v716_v39 = vmax.f32 %v656_v32, 0.0 }
  0xfd   : > { %v1755_v29 = vpop.f32.mrf.mxu0 }
  0xfe   : > { %v659_v31 = vadd.f32 %v1755_v29, %v2040_v21  ;;  %1782 = vmatprep.mubr.msk.bf16.mxu1 %vm757_vm2, %v734_v27  ;;  %v714_v37 = vmax.f32 %v648_v30, 0.0 }
  0xff   : > { %v650_v33 = vpop.f32.mrf.mxu0  ;;  %1783 = vmatmul.mubr.msk.bf16.gmra.mxu1 %vm757_vm2, %v735_v28 }
 0x100   : > { %v651_v34 = vadd.f32 %v2040_v21, %v650_v33  ;;  %v717_v35 = vmax.f32 %v659_v31, 0.0 }
 0x101   : > { %v1758_v36 = vpop.f32.mrf.mxu0 }
 0x102   : > { %v715_v38 = vmax.f32 %v651_v34, 0.0  ;;  %v737_v42 = vpack.c.bf16 %v717_v35, %v716_v39  ;;  %v672_v46 = vadd.f32 %v1758_v36, %v2040_v21 }
 0x103   : > { %v663_v40 = vpop.f32.mrf.mxu0 }
 0x104   : > { %v736_v41 = vpack.c.bf16 %v715_v38, %v714_v37  ;;  %v664_v44 = vadd.f32 %v2040_v21, %v663_v40  ;;  %v720_v53 = vmax.f32 %v672_v46, 0.0 }
 0x105   : > { %v1759_v43 = vpop.f32.mrf.mxu0 }
 0x106   : > { %v675_v45 = vadd.f32 %v1759_v43, %v2040_v21  ;;  %1786 = vmatprep.mubr.msk.bf16.mxu1 %vm757_vm2, %v736_v41  ;;  %v718_v51 = vmax.f32 %v664_v44, 0.0 }
 0x107   : > { %v666_v47 = vpop.f32.mrf.mxu0  ;;  %1787 = vmatmul.mubr.msk.bf16.gmra.mxu1 %vm757_vm2, %v737_v42 }
 0x108   : > { %v667_v48 = vadd.f32 %v2040_v21, %v666_v47  ;;  %v721_v49 = vmax.f32 %v675_v45, 0.0 }
 0x109   : > { %v1762_v50 = vpop.f32.mrf.mxu0 }
 0x10a   : > { %v719_v52 = vmax.f32 %v667_v48, 0.0  ;;  %v739_v56 = vpack.c.bf16 %v721_v49, %v720_v53  ;;  %v688_v60 = vadd.f32 %v1762_v50, %v2040_v21 }
 0x10b   : > { %v679_v54 = vpop.f32.mrf.mxu0 }
 0x10c   : > { %v738_v55 = vpack.c.bf16 %v719_v52, %v718_v51  ;;  %v680_v58 = vadd.f32 %v2040_v21, %v679_v54  ;;  %v724_v2 = vmax.f32 %v688_v60, 0.0 }
 0x10d   : > { %v1763_v57 = vpop.f32.mrf.mxu0 }
 0x10e   : > { %v691_v59 = vadd.f32 %v1763_v57, %v2040_v21  ;;  %1790 = vmatprep.mubr.msk.bf16.mxu1 %vm757_vm2, %v738_v55  ;;  %v722_v0 = vmax.f32 %v680_v58, 0.0 }
 0x10f   : > { %v682_v61 = vpop.f32.mrf.mxu0  ;;  %1791 = vmatmul.mubr.msk.bf16.gmra.mxu1 %vm757_vm2, %v739_v56 }
 0x110   : > { %v683_v62 = vadd.f32 %v2040_v21, %v682_v61  ;;  %v725_v63 = vmax.f32 %v691_v59, 0.0 }
 0x112   : > { %v723_v1 = vmax.f32 %v683_v62, 0.0  ;;  %v741_v4 = vpack.c.bf16 %v725_v63, %v724_v2 }
 0x114   : > { %v740_v3 = vpack.c.bf16 %v723_v1, %v722_v0 }
 0x116   : > { %1794 = vmatprep.mubr.msk.bf16.mxu1 %vm757_vm2, %v740_v3 }
 0x117   : > { %1795 = vmatmul.mubr.msk.bf16.gmra.mxu1 %vm757_vm2, %v741_v4 }
 0x19f   : > { %v1768_v6 = vpop.f32.mrf.mxu1 }
 0x1a0   : > { %v2096_v7 = vadd.f32 %v1768_v6, %v2093_v5 }
 0x1a1   : > { %v840_v21 = vpop.f32.mrf.mxu1 }
 0x1a2   : > { %v2099_v8 = vadd.f32 %v2093_v5, %v840_v21  ;;  %v973_v9 = vsel %vm480_vm1, %v2096_v7, 0.0 }
 0x1a3   : > { %974 = vadd.xlane.f32.xlu1 %v973_v9  ;;  %v1769_v10 = vpop.f32.mrf.mxu1 }
 0x1a4   : > { %v2104_v11 = vadd.f32 %v1769_v10, %v2093_v5  ;;  %v967_v12 = vsel %vm480_vm1, %v2099_v8, 0.0 }
 0x1a5   : > { %v843_v13 = vpop.f32.mrf.mxu1  ;;  %968 = vadd.xlane.f32.xlu0 %v967_v12 }
 0x1a6   : > { %v2109_v14 = vadd.f32 %v2093_v5, %v843_v13  ;;  %v976_v15 = vsel %vm480_vm1, %v2104_v11, 0.0 }
 0x1a7   : > { %977 = vadd.xlane.f32.xlu1 %v976_v15  ;;  %v1772_v16 = vpop.f32.mrf.mxu1 }
 0x1a8   : > { %v2114_v17 = vadd.f32 %v1772_v16, %v2093_v5  ;;  %v970_v18 = vsel %vm480_vm1, %v2109_v14, 0.0 }
 0x1a9   : > { %v856_v19 = vpop.f32.mrf.mxu1  ;;  %971 = vadd.xlane.f32.xlu0 %v970_v18 }
 0x1aa   : > { %v2119_v22 = vadd.f32 %v2093_v5, %v856_v19  ;;  %v985_v24 = vsel %vm480_vm1, %v2114_v17, 0.0 }
 0x1ab   : > { %v1773_v20 = vpop.f32.mrf.mxu1 }
 0x1ac   : > { %v2122_v23 = vadd.f32 %v1773_v20, %v2093_v5  ;;  %v979_v30 = vsel %vm480_vm1, %v2119_v22, 0.0 }
 0x1ad   : > { %v859_v25 = vpop.f32.mrf.mxu1  ;;  %986 = vadd.xlane.f32.xlu0 %v985_v24 }
 0x1ae   : > { %v2127_v26 = vadd.f32 %v2093_v5, %v859_v25  ;;  %v988_v27 = vsel %vm480_vm1, %v2122_v23, 0.0 }
 0x1af   : > { %989 = vadd.xlane.f32.xlu1 %v988_v27  ;;  %v1776_v28 = vpop.f32.mrf.mxu1 }
 0x1b0   : > { %v2132_v29 = vadd.f32 %v1776_v28, %v2093_v5  ;;  %v982_v32 = vsel %vm480_vm1, %v2127_v26, 0.0 }
 0x1b1   : > { %v872_v31 = vpop.f32.mrf.mxu1  ;;  %980 = vadd.xlane.f32.xlu0 %v979_v30 }
 0x1b2   : > { %v2139_v34 = vadd.f32 %v2093_v5, %v872_v31  ;;  %v997_v36 = vsel %vm480_vm1, %v2132_v29, 0.0 }
 0x1b3   : > { %v1777_v33 = vpop.f32.mrf.mxu1  ;;  %983 = vadd.xlane.f32.xlu1 %v982_v32 }
 0x1b4   : > { %v2142_v35 = vadd.f32 %v1777_v33, %v2093_v5  ;;  %v991_v42 = vsel %vm480_vm1, %v2139_v34, 0.0 }
 0x1b5   : > { %v875_v37 = vpop.f32.mrf.mxu1  ;;  %998 = vadd.xlane.f32.xlu0 %v997_v36 }
 0x1b6   : > { %v2147_v38 = vadd.f32 %v2093_v5, %v875_v37  ;;  %v1000_v39 = vsel %vm480_vm1, %v2142_v35, 0.0 }
 0x1b7   : > { %v1780_v40 = vpop.f32.mrf.mxu1  ;;  %1001 = vadd.xlane.f32.xlu1 %v1000_v39 }
 0x1b8   : > { %v2152_v41 = vadd.f32 %v1780_v40, %v2093_v5  ;;  %v994_v44 = vsel %vm480_vm1, %v2147_v38, 0.0 }
 0x1b9   : > { %v888_v43 = vpop.f32.mrf.mxu1  ;;  %992 = vadd.xlane.f32.xlu0 %v991_v42 }
 0x1ba   : > { %v2159_v46 = vadd.f32 %v2093_v5, %v888_v43  ;;  %v1009_v48 = vsel %vm480_vm1, %v2152_v41, 0.0 }
 0x1bb   : > { %v1781_v45 = vpop.f32.mrf.mxu1  ;;  %995 = vadd.xlane.f32.xlu1 %v994_v44 }
 0x1bc   : > { %v2162_v47 = vadd.f32 %v1781_v45, %v2093_v5  ;;  %v1003_v54 = vsel %vm480_vm1, %v2159_v46, 0.0 }
 0x1bd   : > { %v891_v49 = vpop.f32.mrf.mxu1  ;;  %1010 = vadd.xlane.f32.xlu0 %v1009_v48 }
 0x1be   : > { %v2167_v50 = vadd.f32 %v2093_v5, %v891_v49  ;;  %v1012_v51 = vsel %vm480_vm1, %v2162_v47, 0.0 }
 0x1bf   : > { %v1784_v52 = vpop.f32.mrf.mxu1  ;;  %1013 = vadd.xlane.f32.xlu1 %v1012_v51 }
 0x1c0   : > { %v2172_v53 = vadd.f32 %v1784_v52, %v2093_v5  ;;  %v1006_v56 = vsel %vm480_vm1, %v2167_v50, 0.0 }
 0x1c1   : > { %v904_v55 = vpop.f32.mrf.mxu1  ;;  %1004 = vadd.xlane.f32.xlu0 %v1003_v54 }
 0x1c2   : > { %v2179_v58 = vadd.f32 %v2093_v5, %v904_v55  ;;  %v1021_v60 = vsel %vm480_vm1, %v2172_v53, 0.0 }
 0x1c3   : > { %v1785_v57 = vpop.f32.mrf.mxu1  ;;  %1007 = vadd.xlane.f32.xlu1 %v1006_v56 }
 0x1c4   : > { %v2182_v59 = vadd.f32 %v1785_v57, %v2093_v5  ;;  %v1015_v2 = vsel %vm480_vm1, %v2179_v58, 0.0 }
 0x1c5   : > { %v907_v61 = vpop.f32.mrf.mxu1  ;;  %1022 = vadd.xlane.f32.xlu0 %v1021_v60 }
 0x1c6   : > { %v2187_v62 = vadd.f32 %v2093_v5, %v907_v61  ;;  %v1024_v63 = vsel %vm480_vm1, %v2182_v59, 0.0 }
 0x1c7   : > { %v1788_v0 = vpop.f32.mrf.mxu1  ;;  %1025 = vadd.xlane.f32.xlu1 %v1024_v63 }
 0x1c8   : > { %v2192_v1 = vadd.f32 %v1788_v0, %v2093_v5  ;;  %v1018_v4 = vsel %vm480_vm1, %v2187_v62, 0.0 }
 0x1c9   : > { %v920_v3 = vpop.f32.mrf.mxu1  ;;  %1016 = vadd.xlane.f32.xlu0 %v1015_v2 }
 0x1ca   : > { %v2199_v21 = vadd.f32 %v2093_v5, %v920_v3  ;;  %v1033_v10 = vsel %vm480_vm1, %v2192_v1, 0.0 }
 0x1cb   : > { %v1789_v6 = vpop.f32.mrf.mxu1  ;;  %1019 = vadd.xlane.f32.xlu1 %v1018_v4 }
 0x1cc   : > { %v2202_v9 = vadd.f32 %v1789_v6, %v2093_v5  ;;  %v1027_v19 = vsel %vm480_vm1, %v2199_v21, 0.0 }
 0x1cd   : > { %v923_v12 = vpop.f32.mrf.mxu1  ;;  %1034 = vadd.xlane.f32.xlu0 %v1033_v10 }
 0x1ce   : > { %v2207_v13 = vadd.f32 %v2093_v5, %v923_v12  ;;  %v1036_v15 = vsel %vm480_vm1, %v2202_v9, 0.0 }
 0x1cf   : > { %v1792_v16 = vpop.f32.mrf.mxu1  ;;  %1037 = vadd.xlane.f32.xlu1 %v1036_v15 }
 0x1d0   : > { %v2212_v18 = vadd.f32 %v1792_v16, %v2093_v5  ;;  %v1030_v24 = vsel %vm480_vm1, %v2207_v13, 0.0 }
 0x1d1   : > { %v936_v20 = vpop.f32.mrf.mxu1  ;;  %1028 = vadd.xlane.f32.xlu0 %v1027_v19 }
 0x1d2   : > { %v2219_v27 = vadd.f32 %v2093_v5, %v936_v20  ;;  %v1045_v30 = vsel %vm480_vm1, %v2212_v18, 0.0 }
 0x1d3   : > { %v1793_v25 = vpop.f32.mrf.mxu1  ;;  %1031 = vadd.xlane.f32.xlu1 %v1030_v24 }
 0x1d4   : > { %v2222_v28 = vadd.f32 %v1793_v25, %v2093_v5  ;;  %v1039_v37 = vsel %vm480_vm1, %v2219_v27, 0.0 }
 0x1d5   : > { %v939_v31 = vpop.f32.mrf.mxu1  ;;  %1046 = vadd.xlane.f32.xlu0 %v1045_v30 }
 0x1d6   : > { %v2227_v32 = vadd.f32 %v2093_v5, %v939_v31  ;;  %v1048_v33 = vsel %vm480_vm1, %v2222_v28, 0.0 }
 0x1d7   : > { %v1796_v36 = vpop.f32.mrf.mxu1  ;;  %1049 = vadd.xlane.f32.xlu1 %v1048_v33 }
 0x1d8   : > { %v1042_v42 = vsel %vm480_vm1, %v2227_v32, 0.0  ;;  %v2239_v44 = vadd.f32 %v1796_v36, %v2093_v5 }
 0x1d9   : > { %v952_v39 = vpop.f32.mrf.mxu1  ;;  %1040 = vadd.xlane.f32.xlu0 %v1039_v37 }
 0x1da   : > { %v2234_v40 = vadd.f32 %v2093_v5, %v952_v39  ;;  %v1057_v54 = vsel %vm480_vm1, %v2239_v44, 0.0 }
 0x1db   : > { %v1797_v43 = vpop.f32.mrf.mxu1  ;;  %1043 = vadd.xlane.f32.xlu1 %v1042_v42 }
 0x1dc   : > { %v1051_v45 = vsel %vm480_vm1, %v2234_v40, 0.0  ;;  %v2247_v51 = vadd.f32 %v1797_v43, %v2093_v5 }
 0x1dd   : > { %v955_v48 = vpop.f32.mrf.mxu1  ;;  %1052 = vadd.xlane.f32.xlu0 %v1051_v45 }
 0x1de   : > { %v2244_v49 = vadd.f32 %v2093_v5, %v955_v48  ;;  %v1060_v55 = vsel %vm480_vm1, %v2247_v51, 0.0 }
 0x1e0   : > { %v1054_v52 = vsel %vm480_vm1, %v2244_v49, 0.0 }
 0x1e1   : > { %1055 = vadd.xlane.f32.xlu1 %v1054_v52  ;;  %1058 = vadd.xlane.f32.xlu0 %v1057_v54 }
 0x1e5   : > { %1061 = vadd.xlane.f32.xlu1 %v1060_v55 }
 0x22c   : > { %v975_v56 = vpop.xlane.xlu1 %974 }
 0x22d   : > { %v1066_v57 = vmul.f32 0.125, %v975_v56 }
 0x22e   : > { %v969_v60 = vpop.xlane.xlu0 %968 }
 0x22f   : > { %v2256_v61 = vsub.f32 %v2096_v7, %v1066_v57  ;;  %v1064_v5 = vmul.f32 0.125, %v969_v60 }
 0x230   : > { %v978_v63 = vpop.xlane.xlu1 %977 }
 0x231   : > { %v2259_v0 = vsub.f32 %v2099_v8, %v1064_v5  ;;  %v1067_v2 = vmul.f32 0.125, %v978_v63  ;;  %v1130_v3 = vmul.f32 %v2256_v61, %v2256_v61 }
 0x232   : > { %v972_v4 = vpop.xlane.xlu0 %971 }
 0x233   : > { %v2264_v6 = vsub.f32 %v2104_v11, %v1067_v2  ;;  %v1065_v10 = vmul.f32 0.125, %v972_v4  ;;  %v1166_v12 = vsel %vm480_vm1, %v1130_v3, 0.0  ;;  %v1128_v7 = vmul.f32 %v2259_v0, %v2259_v0 }
 0x234   : > { %1167 = vadd.xlane.f32.xlu0 %v1166_v12 }
 0x235   : > { %v2270_v15 = vsub.f32 %v2109_v14, %v1065_v10  ;;  %v1131_v8 = vmul.f32 %v2264_v6, %v2264_v6  ;;  %v1160_v11 = vsel %vm480_vm1, %v1128_v7, 0.0 }
 0x236   : > { %v987_v16 = vpop.xlane.xlu0 %986 }
 0x237   : > { %v1070_v19 = vmul.f32 0.125, %v987_v16  ;;  %v1169_v20 = vsel %vm480_vm1, %v1131_v8, 0.0  ;;  %v1129_v24 = vmul.f32 %v2270_v15, %v2270_v15 }
 0x238   : > { %v990_v25 = vpop.xlane.xlu1 %989  ;;  %1170 = vadd.xlane.f32.xlu1 %v1169_v20  ;;  %1161 = vadd.xlane.f32.xlu0 %v1160_v11 }
 0x239   : > { %v2279_v30 = vsub.f32 %v2114_v17, %v1070_v19  ;;  %v1071_v14 = vmul.f32 0.125, %v990_v25  ;;  %v1163_v37 = vsel %vm480_vm1, %v1129_v24, 0.0 }
 0x23a   : > { %v981_v31 = vpop.xlane.xlu0 %980 }
 0x23b   : > { %v2282_v33 = vsub.f32 %v2122_v23, %v1071_v14  ;;  %v1068_v36 = vmul.f32 0.125, %v981_v31  ;;  %v1134_v39 = vmul.f32 %v2279_v30, %v2279_v30 }
 0x23c   : > { %v984_v42 = vpop.xlane.xlu1 %983  ;;  %1164 = vadd.xlane.f32.xlu1 %v1163_v37 }
 0x23d   : > { %v2288_v43 = vsub.f32 %v2119_v22, %v1068_v36  ;;  %v1069_v45 = vmul.f32 0.125, %v984_v42  ;;  %v1178_v17 = vsel %vm480_vm1, %v1134_v39, 0.0  ;;  %v1135_v48 = vmul.f32 %v2282_v33, %v2282_v33 }
 0x23e   : > { %1179 = vadd.xlane.f32.xlu0 %v1178_v17  ;;  %v999_v23 = vpop.xlane.xlu0 %998 }
 0x23f   : > { %v2294_v52 = vsub.f32 %v2127_v26, %v1069_v45  ;;  %v1074_v54 = vmul.f32 0.125, %v999_v23  ;;  %v1181_v55 = vsel %vm480_vm1, %v1135_v48, 0.0  ;;  %v1132_v56 = vmul.f32 %v2288_v43, %v2288_v43 }
 0x240   : > { %v1002_v57 = vpop.xlane.xlu1 %1001  ;;  %1182 = vadd.xlane.f32.xlu1 %v1181_v55 }
 0x241   : > { %v2300_v22 = vsub.f32 %v2132_v29, %v1074_v54  ;;  %v1075_v60 = vmul.f32 0.125, %v1002_v57  ;;  %v1172_v5 = vsel %vm480_vm1, %v1132_v56, 0.0  ;;  %v1133_v63 = vmul.f32 %v2294_v52, %v2294_v52 }
 0x242   : > { %1173 = vadd.xlane.f32.xlu0 %v1172_v5  ;;  %v993_v26 = vpop.xlane.xlu0 %992 }
 0x243   : > { %v2306_v2 = vsub.f32 %v2142_v35, %v1075_v60  ;;  %v1072_v3 = vmul.f32 0.125, %v993_v26  ;;  %v1175_v4 = vsel %vm480_vm1, %v1133_v63, 0.0  ;;  %v1138_v10 = vmul.f32 %v2300_v22, %v2300_v22 }
 0x244   : > { %v996_v12 = vpop.xlane.xlu1 %995  ;;  %1176 = vadd.xlane.f32.xlu1 %v1175_v4 }
 0x245   : > { %v2312_v29 = vsub.f32 %v2139_v34, %v1072_v3  ;;  %v1073_v7 = vmul.f32 0.125, %v996_v12  ;;  %v1190_v8 = vsel %vm480_vm1, %v1138_v10, 0.0  ;;  %v1139_v16 = vmul.f32 %v2306_v2, %v2306_v2 }
 0x246   : > { %1191 = vadd.xlane.f32.xlu0 %v1190_v8  ;;  %v1011_v35 = vpop.xlane.xlu0 %1010 }
 0x247   : > { %v2318_v19 = vsub.f32 %v2147_v38, %v1073_v7  ;;  %v1078_v20 = vmul.f32 0.125, %v1011_v35  ;;  %v1193_v11 = vsel %vm480_vm1, %v1139_v16, 0.0  ;;  %v1136_v24 = vmul.f32 %v2312_v29, %v2312_v29 }
 0x248   : > { %v1014_v25 = vpop.xlane.xlu1 %1013  ;;  %1194 = vadd.xlane.f32.xlu1 %v1193_v11 }
 0x249   : > { %v2324_v34 = vsub.f32 %v2152_v41, %v1078_v20  ;;  %v1079_v14 = vmul.f32 0.125, %v1014_v25  ;;  %v1184_v31 = vsel %vm480_vm1, %v1136_v24, 0.0  ;;  %v1137_v36 = vmul.f32 %v2318_v19, %v2318_v19 }
 0x24a   : > { %1185 = vadd.xlane.f32.xlu0 %v1184_v31  ;;  %v1005_v38 = vpop.xlane.xlu0 %1004 }
 0x24b   : > { %v2330_v37 = vsub.f32 %v2162_v47, %v1079_v14  ;;  %v1076_v39 = vmul.f32 0.125, %v1005_v38  ;;  %v1187_v42 = vsel %vm480_vm1, %v1137_v36, 0.0  ;;  %v1142_v45 = vmul.f32 %v2324_v34, %v2324_v34 }
 0x24c   : > { %v1008_v17 = vpop.xlane.xlu1 %1007  ;;  %1188 = vadd.xlane.f32.xlu1 %v1187_v42 }
 0x24d   : > { %v2336_v41 = vsub.f32 %v2159_v46, %v1076_v39  ;;  %v1077_v48 = vmul.f32 0.125, %v1008_v17  ;;  %v1202_v23 = vsel %vm480_vm1, %v1142_v45, 0.0  ;;  %v1143_v54 = vmul.f32 %v2330_v37, %v2330_v37 }
 0x24e   : > { %1203 = vadd.xlane.f32.xlu0 %v1202_v23  ;;  %v1023_v47 = vpop.xlane.xlu0 %1022 }
 0x24f   : > { %v2342_v55 = vsub.f32 %v2167_v50, %v1077_v48  ;;  %v1082_v56 = vmul.f32 0.125, %v1023_v47  ;;  %v1205_v57 = vsel %vm480_vm1, %v1143_v54, 0.0  ;;  %v1140_v60 = vmul.f32 %v2336_v41, %v2336_v41 }
 0x250   : > { %v1026_v5 = vpop.xlane.xlu1 %1025  ;;  %1206 = vadd.xlane.f32.xlu1 %v1205_v57 }
 0x251   : > { %v2348_v46 = vsub.f32 %v2172_v53, %v1082_v56  ;;  %v1083_v63 = vmul.f32 0.125, %v1026_v5  ;;  %v1196_v26 = vsel %vm480_vm1, %v1140_v60, 0.0  ;;  %v1141_v3 = vmul.f32 %v2342_v55, %v2342_v55 }
 0x252   : > { %1197 = vadd.xlane.f32.xlu0 %v1196_v26  ;;  %v1017_v50 = vpop.xlane.xlu0 %1016 }
 0x253   : > { %v2354_v4 = vsub.f32 %v2182_v59, %v1083_v63  ;;  %v1080_v10 = vmul.f32 0.125, %v1017_v50  ;;  %v1199_v12 = vsel %vm480_vm1, %v1141_v3, 0.0  ;;  %v1146_v7 = vmul.f32 %v2348_v46, %v2348_v46 }
 0x254   : > { %v1020_v8 = vpop.xlane.xlu1 %1019  ;;  %1200 = vadd.xlane.f32.xlu1 %v1199_v12 }
 0x255   : > { %v2360_v53 = vsub.f32 %v2179_v58, %v1080_v10  ;;  %v1081_v16 = vmul.f32 0.125, %v1020_v8  ;;  %v1214_v35 = vsel %vm480_vm1, %v1146_v7, 0.0  ;;  %v1147_v20 = vmul.f32 %v2354_v4, %v2354_v4 }
 0x256   : > { %1215 = vadd.xlane.f32.xlu0 %v1214_v35  ;;  %v1035_v59 = vpop.xlane.xlu0 %1034 }
 0x257   : > { %v2366_v11 = vsub.f32 %v2187_v62, %v1081_v16  ;;  %v1086_v24 = vmul.f32 0.125, %v1035_v59  ;;  %v1217_v25 = vsel %vm480_vm1, %v1147_v20, 0.0  ;;  %v1144_v14 = vmul.f32 %v2360_v53, %v2360_v53 }
 0x258   : > { %v1038_v31 = vpop.xlane.xlu1 %1037  ;;  %1218 = vadd.xlane.f32.xlu1 %v1217_v25 }
 0x259   : > { %v2372_v58 = vsub.f32 %v2192_v1, %v1086_v24  ;;  %v1087_v36 = vmul.f32 0.125, %v1038_v31  ;;  %v1208_v38 = vsel %vm480_vm1, %v1144_v14, 0.0  ;;  %v1145_v39 = vmul.f32 %v2366_v11, %v2366_v11 }
 0x25a   : > { %1209 = vadd.xlane.f32.xlu0 %v1208_v38  ;;  %v1029_v62 = vpop.xlane.xlu0 %1028 }
 0x25b   : > { %v2378_v42 = vsub.f32 %v2202_v9, %v1087_v36  ;;  %v1084_v45 = vmul.f32 0.125, %v1029_v62  ;;  %v1211_v17 = vsel %vm480_vm1, %v1145_v39, 0.0  ;;  %v1150_v48 = vmul.f32 %v2372_v58, %v2372_v58 }
 0x25c   : > { %v1032_v23 = vpop.xlane.xlu1 %1031  ;;  %1212 = vadd.xlane.f32.xlu1 %v1211_v17 }
 0x25d   : > { %v2384_v1 = vsub.f32 %v2199_v21, %v1084_v45  ;;  %v1085_v54 = vmul.f32 0.125, %v1032_v23  ;;  %v1226_v47 = vsel %vm480_vm1, %v1150_v48, 0.0  ;;  %v1151_v56 = vmul.f32 %v2378_v42, %v2378_v42 }
 0x25e   : > { %1227 = vadd.xlane.f32.xlu0 %v1226_v47  ;;  %v1047_v9 = vpop.xlane.xlu0 %1046 }
 0x25f   : > { %v2390_v57 = vsub.f32 %v2207_v13, %v1085_v54  ;;  %v1090_v60 = vmul.f32 0.125, %v1047_v9  ;;  %v1229_v5 = vsel %vm480_vm1, %v1151_v56, 0.0  ;;  %v1148_v63 = vmul.f32 %v2384_v1, %v2384_v1 }
 0x260   : > { %v1050_v26 = vpop.xlane.xlu1 %1049  ;;  %1230 = vadd.xlane.f32.xlu1 %v1229_v5 }
 0x261   : > { %v2396_v21 = vsub.f32 %v2212_v18, %v1090_v60  ;;  %v1091_v3 = vmul.f32 0.125, %v1050_v26  ;;  %v1220_v50 = vsel %vm480_vm1, %v1148_v63, 0.0  ;;  %v1149_v10 = vmul.f32 %v2390_v57, %v2390_v57 }
 0x262   : > { %1221 = vadd.xlane.f32.xlu0 %v1220_v50  ;;  %v1041_v13 = vpop.xlane.xlu0 %1040 }
 0x263   : > { %v2402_v12 = vsub.f32 %v2222_v28, %v1091_v3  ;;  %v1088_v7 = vmul.f32 0.125, %v1041_v13  ;;  %v1223_v8 = vsel %vm480_vm1, %v1149_v10, 0.0  ;;  %v1154_v16 = vmul.f32 %v2396_v21, %v2396_v21 }
 0x264   : > { %v1044_v35 = vpop.xlane.xlu1 %1043  ;;  %1224 = vadd.xlane.f32.xlu1 %v1223_v8 }
 0x265   : > { %v2408_v18 = vsub.f32 %v2219_v27, %v1088_v7  ;;  %v1089_v20 = vmul.f32 0.125, %v1044_v35  ;;  %v1238_v59 = vsel %vm480_vm1, %v1154_v16, 0.0  ;;  %v1155_v24 = vmul.f32 %v2402_v12, %v2402_v12 }
 0x266   : > { %1239 = vadd.xlane.f32.xlu0 %v1238_v59  ;;  %v1053_v28 = vpop.xlane.xlu0 %1052 }
 0x267   : > { %v2414_v25 = vsub.f32 %v2227_v32, %v1089_v20  ;;  %v1092_v14 = vmul.f32 0.125, %v1053_v28  ;;  %v1241_v31 = vsel %vm480_vm1, %v1155_v24, 0.0  ;;  %v1152_v36 = vmul.f32 %v2408_v18, %v2408_v18 }
 0x268   : > { %1242 = vadd.xlane.f32.xlu1 %v1241_v31 }
 0x269   : > { %v2420_v27 = vsub.f32 %v2234_v40, %v1092_v14  ;;  %v1232_v38 = vsel %vm480_vm1, %v1152_v36, 0.0  ;;  %v1153_v39 = vmul.f32 %v2414_v25, %v2414_v25 }
 0x26a   : > { %v1056_v62 = vpop.xlane.xlu1 %1055  ;;  %1233 = vadd.xlane.f32.xlu0 %v1232_v38  ;;  %v1059_v45 = vpop.xlane.xlu0 %1058 }
 0x26b   : > { %v1093_v32 = vmul.f32 0.125, %v1056_v62  ;;  %v1094_v17 = vmul.f32 0.125, %v1059_v45  ;;  %v1235_v48 = vsel %vm480_vm1, %v1153_v39, 0.0  ;;  %v1156_v23 = vmul.f32 %v2420_v27, %v2420_v27 }
 0x26c   : > { %1236 = vadd.xlane.f32.xlu1 %v1235_v48 }
 0x26d   : > { %v2429_v54 = vsub.f32 %v2244_v49, %v1093_v32  ;;  %v2432_v40 = vsub.f32 %v2239_v44, %v1094_v17  ;;  %v1244_v47 = vsel %vm480_vm1, %v1156_v23, 0.0 }
 0x26e   : > { %v1062_v56 = vpop.xlane.xlu1 %1061  ;;  %1245 = vadd.xlane.f32.xlu0 %v1244_v47 }
 0x26f   : > { %v1095_v9 = vmul.f32 0.125, %v1062_v56  ;;  %v1157_v60 = vmul.f32 %v2429_v54, %v2429_v54  ;;  %v1158_v5 = vmul.f32 %v2432_v40, %v2432_v40  ;;  %v2450_v56 = vld [vmem:[%s2675_s5] ss:$0 sm:$0xff] }
 0x271   : > { %v2440_v63 = vsub.f32 %v2247_v51, %v1095_v9  ;;  %v1247_v49 = vsel %vm480_vm1, %v1157_v60, 0.0  ;;  %v1250_v26 = vsel %vm480_vm1, %v1158_v5, 0.0 }
 0x272   : > { %1248 = vadd.xlane.f32.xlu1 %v1247_v49  ;;  %1251 = vadd.xlane.f32.xlu0 %v1250_v26  ;;  %v2460_v26 = vld [vmem:[%s2676_s6] ss:$0 sm:$0xff] }
 0x273   : > { %v1159_v44 = vmul.f32 %v2440_v63, %v2440_v63 }
 0x275   : > { %v1253_v3 = vsel %vm480_vm1, %v1159_v44, 0.0 }
 0x276   : > { %1254 = vadd.xlane.f32.xlu1 %v1253_v3 }
 0x2bd   : > { %v1168_v50 = vpop.xlane.xlu0 %1167 }
 0x2be   : > { %v1258_v10 = vmul.f32 0.125, %v1168_v50 }
 0x2c0   : > { %v1290_v13 = vadd.f32 1e-05, %v1258_v10 }
 0x2c1   : > { %v1171_v7 = vpop.xlane.xlu1 %1170  ;;  %v1162_v8 = vpop.xlane.xlu0 %1161 }
 0x2c2   : > { %1840 = vrsqrt.f32 %v1290_v13  ;;  %v1259_v51 = vmul.f32 0.125, %v1171_v7  ;;  %v1256_v16 = vmul.f32 0.125, %v1162_v8  ;;  %v2464_v7 = vld [vmem:[%s348_s25] ss:$0 sm:$0xff] }
 0x2c4   : > { %v1291_v35 = vadd.f32 1e-05, %v1259_v51  ;;  %v1288_v20 = vadd.f32 1e-05, %v1256_v16 }
 0x2c5   : > { %v1165_v59 = vpop.xlane.xlu1 %1164 }
 0x2c6   : > { %1842 = vrsqrt.f32 %v1291_v35  ;;  %v1257_v24 = vmul.f32 0.125, %v1165_v59 }
 0x2c7   : > { %1844 = vrsqrt.f32 %v1288_v20  ;;  %v1180_v28 = vpop.xlane.xlu0 %1179 }
 0x2c8   : > { %v1289_v14 = vadd.f32 1e-05, %v1257_v24  ;;  %v1262_v31 = vmul.f32 0.125, %v1180_v28 }
 0x2c9   : > { %v1183_v36 = vpop.xlane.xlu1 %1182 }
 0x2ca   : > { %1846 = vrsqrt.f32 %v1289_v14  ;;  %v1294_v38 = vadd.f32 1e-05, %v1262_v31  ;;  %v1263_v39 = vmul.f32 0.125, %v1183_v36 }
 0x2cb   : > { %v1174_v62 = vpop.xlane.xlu0 %1173 }
 0x2cc   : > { %1848 = vrsqrt.f32 %v1294_v38  ;;  %v1295_v45 = vadd.f32 1e-05, %v1263_v39  ;;  %v1260_v32 = vmul.f32 0.125, %v1174_v62 }
 0x2cd   : > { %v1177_v17 = vpop.xlane.xlu1 %1176 }
 0x2ce   : > { %1850 = vrsqrt.f32 %v1295_v45  ;;  %v1292_v48 = vadd.f32 1e-05, %v1260_v32  ;;  %v1261_v23 = vmul.f32 0.125, %v1177_v17 }
 0x2cf   : > { %v1841_v47 = vpop.eup %1840  ;;  %v1192_v9 = vpop.xlane.xlu0 %1191 }
 0x2d0   : > { %v1354_v60 = vmul.f32 %v1841_v47, %v2256_v61  ;;  %1852 = vrsqrt.f32 %v1292_v48  ;;  %v1293_v5 = vadd.f32 1e-05, %v1261_v23  ;;  %v1266_v49 = vmul.f32 0.125, %v1192_v9 }
 0x2d1   : > { %v1195_v44 = vpop.xlane.xlu1 %1194 }
 0x2d2   : > { %v1393_v3 = vmul.f32 %v2450_v56, %v1354_v60  ;;  %1854 = vrsqrt.f32 %v1293_v5  ;;  %v1298_v50 = vadd.f32 1e-05, %v1266_v49  ;;  %v1267_v10 = vmul.f32 0.125, %v1195_v44 }
 0x2d3   : > { %v1843_v13 = vpop.eup %1842  ;;  %v1186_v8 = vpop.xlane.xlu0 %1185 }
 0x2d4   : > { %v1845_v61 = vpop.eup %1844  ;;  %v1432_v51 = vadd.f32 %v2460_v26, %v1393_v3  ;;  %v1355_v16 = vmul.f32 %v1843_v13, %v2264_v6  ;;  %1856 = vrsqrt.f32 %v1298_v50  ;;  %v1299_v35 = vadd.f32 1e-05, %v1267_v10 }
 0x2d5   : > { %v1352_v20 = vmul.f32 %v1845_v61, %v2259_v0  ;;  %v1264_v59 = vmul.f32 0.125, %v1186_v8  ;;  %v1189_v24 = vpop.xlane.xlu1 %1188 }
 0x2d6   : > { %v1471_v28 = vmul.f32 %v2464_v7, %v1432_v51  ;;  %v1394_v14 = vmul.f32 %v2450_v56, %v1355_v16  ;;  %1858 = vrsqrt.f32 %v1299_v35  ;;  %v1265_v31 = vmul.f32 0.125, %v1189_v24 }
 0x2d7   : > { %v1847_v36 = vpop.eup %1846  ;;  %v1391_v6 = vmul.f32 %v2450_v56, %v1352_v20  ;;  %v1296_v38 = vadd.f32 1e-05, %v1264_v59  ;;  %v1204_v39 = vpop.xlane.xlu0 %1203 }
 0x2d8   : > { %1503 = vst.msk [vmem:[%s2471_s27 + $0x10] sm:$0xff] %vm480_vm1, %v1471_v28  ;;  %v1433_v62 = vadd.f32 %v2460_v26, %v1394_v14  ;;  %v1353_v45 = vmul.f32 %v1847_v36, %v2270_v15  ;;  %v1297_v0 = vadd.f32 1e-05, %v1265_v31  ;;  %v1270_v32 = vmul.f32 0.125, %v1204_v39 }
 0x2d9   : > { %v1849_v17 = vpop.eup %1848  ;;  %v1430_v48 = vadd.f32 %v2460_v26, %v1391_v6  ;;  %1860 = vrsqrt.f32 %v1296_v38  ;;  %v1207_v23 = vpop.xlane.xlu1 %1206 }
 0x2da   : > { %v1472_v47 = vmul.f32 %v2464_v7, %v1433_v62  ;;  %v1392_v9 = vmul.f32 %v2450_v56, %v1353_v45  ;;  %v1358_v60 = vmul.f32 %v1849_v17, %v2279_v30  ;;  %1862 = vrsqrt.f32 %v1297_v0 }
 0x2db   : > { %v1851_v5 = vpop.eup %1850  ;;  %v1469_v49 = vmul.f32 %v2464_v7, %v1430_v48  ;;  %v1302_v15 = vadd.f32 1e-05, %v1270_v32  ;;  %v1271_v44 = vmul.f32 0.125, %v1207_v23  ;;  %v1198_v3 = vpop.xlane.xlu0 %1197 }
 0x2dc   : > { %1504 = vst.msk [vmem:[%s2471_s27 + $0x18] sm:$0xff] %vm480_vm1, %v1472_v47  ;;  %v1431_v50 = vadd.f32 %v2460_v26, %v1392_v9  ;;  %v1397_v10 = vmul.f32 %v2450_v56, %v1358_v60  ;;  %v1359_v13 = vmul.f32 %v1851_v5, %v2282_v33  ;;  %v1268_v8 = vmul.f32 0.125, %v1198_v3 }
 0x2dd   : > { %v1853_v61 = vpop.eup %1852  ;;  %1501 = vst.msk [vmem:[%s2471_s27] sm:$0xff] %vm480_vm1, %v1469_v49  ;;  %1864 = vrsqrt.f32 %v1302_v15  ;;  %v1303_v30 = vadd.f32 1e-05, %v1271_v44  ;;  %v1201_v51 = vpop.xlane.xlu1 %1200 }
 0x2de   : > { %v1470_v16 = vmul.f32 %v2464_v7, %v1431_v50  ;;  %v1436_v35 = vadd.f32 %v2460_v26, %v1397_v10  ;;  %v1398_v20 = vmul.f32 %v2450_v56, %v1359_v13  ;;  %v1356_v59 = vmul.f32 %v1853_v61, %v2288_v43 }
 0x2df   : > { %v1855_v24 = vpop.eup %1854  ;;  %1866 = vrsqrt.f32 %v1303_v30  ;;  %v1300_v33 = vadd.f32 1e-05, %v1268_v8  ;;  %v1269_v28 = vmul.f32 0.125, %v1201_v51  ;;  %v1216_v14 = vpop.xlane.xlu0 %1215 }
 0x2e0   : > { %1502 = vst.msk [vmem:[%s2471_s27 + $0x8] sm:$0xff] %vm480_vm1, %v1470_v16  ;;  %v1475_v31 = vmul.f32 %v2464_v7, %v1436_v35  ;;  %v1437_v36 = vadd.f32 %v2460_v26, %v1398_v20  ;;  %v1395_v6 = vmul.f32 %v2450_v56, %v1356_v59  ;;  %v1357_v38 = vmul.f32 %v1855_v24, %v2294_v52 }
 0x2e1   : > { %v1857_v39 = vpop.eup %1856  ;;  %1868 = vrsqrt.f32 %v1300_v33  ;;  %v1301_v43 = vadd.f32 1e-05, %v1269_v28  ;;  %v1274_v62 = vmul.f32 0.125, %v1216_v14  ;;  %v1219_v45 = vpop.xlane.xlu1 %1218 }
 0x2e2   : > { %1507 = vst.msk [vmem:[%s2471_s27 + $0x30] sm:$0xff] %vm480_vm1, %v1475_v31  ;;  %v1476_v0 = vmul.f32 %v2464_v7, %v1437_v36  ;;  %v1434_v32 = vadd.f32 %v2460_v26, %v1395_v6  ;;  %v1396_v17 = vmul.f32 %v2450_v56, %v1357_v38  ;;  %v1362_v48 = vmul.f32 %v1857_v39, %v2300_v22 }
 0x2e3   : > { %v1859_v23 = vpop.eup %1858  ;;  %1870 = vrsqrt.f32 %v1301_v43  ;;  %v1306_v52 = vadd.f32 1e-05, %v1274_v62  ;;  %v1275_v47 = vmul.f32 0.125, %v1219_v45  ;;  %v1210_v9 = vpop.xlane.xlu0 %1209 }
 0x2e4   : > { %1508 = vst.msk [vmem:[%s2471_s27 + $0x38] sm:$0xff] %vm480_vm1, %v1476_v0  ;;  %v1473_v60 = vmul.f32 %v2464_v7, %v1434_v32  ;;  %v1435_v5 = vadd.f32 %v2460_v26, %v1396_v17  ;;  %v1401_v49 = vmul.f32 %v2450_v56, %v1362_v48  ;;  %v1363_v15 = vmul.f32 %v1859_v23, %v2306_v2 }
 0x2e5   : > { %1872 = vrsqrt.f32 %v1306_v52  ;;  %v1307_v44 = vadd.f32 1e-05, %v1275_v47  ;;  %v1272_v22 = vmul.f32 0.125, %v1210_v9  ;;  %v1213_v3 = vpop.xlane.xlu1 %1212 }
 0x2e6   : > { %v1861_v50 = vpop.eup %1860  ;;  %1505 = vst.msk [vmem:[%s2471_s27 + $0x20] sm:$0xff] %vm480_vm1, %v1473_v60  ;;  %v1474_v10 = vmul.f32 %v2464_v7, %v1435_v5  ;;  %v1440_v13 = vadd.f32 %v2460_v26, %v1401_v49  ;;  %v1402_v8 = vmul.f32 %v2450_v56, %v1363_v15  ;;  %v1273_v61 = vmul.f32 0.125, %v1213_v3 }
 0x2e7   : > { %v1863_v30 = vpop.eup %1862  ;;  %v1360_v51 = vmul.f32 %v1861_v50, %v2312_v29  ;;  %1874 = vrsqrt.f32 %v1307_v44  ;;  %v1304_v2 = vadd.f32 1e-05, %v1272_v22  ;;  %v1228_v16 = vpop.xlane.xlu0 %1227 }
 0x2e8   : > { %1506 = vst.msk [vmem:[%s2471_s27 + $0x28] sm:$0xff] %vm480_vm1, %v1474_v10  ;;  %v1479_v35 = vmul.f32 %v2464_v7, %v1440_v13  ;;  %v1441_v20 = vadd.f32 %v2460_v26, %v1402_v8  ;;  %v1361_v59 = vmul.f32 %v1863_v30, %v2318_v19  ;;  %v1305_v24 = vadd.f32 1e-05, %v1273_v61 }
 0x2e9   : > { %v1399_v33 = vmul.f32 %v2450_v56, %v1360_v51  ;;  %1876 = vrsqrt.f32 %v1304_v2  ;;  %v1278_v28 = vmul.f32 0.125, %v1228_v16  ;;  %v1231_v14 = vpop.xlane.xlu1 %1230 }
 0x2ea   : > { %v1865_v31 = vpop.eup %1864  ;;  %1511 = vst.msk [vmem:[%s2471_s27 + $0x50] sm:$0xff] %vm480_vm1, %v1479_v35  ;;  %v1480_v29 = vmul.f32 %v2464_v7, %v1441_v20  ;;  %v1400_v36 = vmul.f32 %v2450_v56, %v1361_v59  ;;  %1878 = vrsqrt.f32 %v1305_v24  ;;  %v1279_v6 = vmul.f32 0.125, %v1231_v14 }
 0x2eb   : > { %v1438_v38 = vadd.f32 %v2460_v26, %v1399_v33  ;;  %v1366_v19 = vmul.f32 %v1865_v31, %v2324_v34  ;;  %v1310_v39 = vadd.f32 1e-05, %v1278_v28  ;;  %v1222_v43 = vpop.xlane.xlu0 %1221 }
 0x2ec   : > { %v1867_v62 = vpop.eup %1866  ;;  %1512 = vst.msk [vmem:[%s2471_s27 + $0x58] sm:$0xff] %vm480_vm1, %v1480_v29  ;;  %v1439_v45 = vadd.f32 %v2460_v26, %v1400_v36  ;;  %v1311_v0 = vadd.f32 1e-05, %v1279_v6  ;;  %v1276_v32 = vmul.f32 0.125, %v1222_v43 }
 0x2ed   : > { %v1477_v17 = vmul.f32 %v2464_v7, %v1438_v38  ;;  %v1405_v48 = vmul.f32 %v2450_v56, %v1366_v19  ;;  %v1367_v23 = vmul.f32 %v1867_v62, %v2330_v37  ;;  %1880 = vrsqrt.f32 %v1310_v39  ;;  %v1225_v52 = vpop.xlane.xlu1 %1224 }
 0x2ee   : > { %v1869_v34 = vpop.eup %1868  ;;  %v1478_v47 = vmul.f32 %v2464_v7, %v1439_v45  ;;  %1882 = vrsqrt.f32 %v1311_v0  ;;  %v1308_v9 = vadd.f32 1e-05, %v1276_v32  ;;  %v1277_v60 = vmul.f32 0.125, %v1225_v52 }
 0x2ef   : > { %1509 = vst.msk [vmem:[%s2471_s27 + $0x40] sm:$0xff] %vm480_vm1, %v1477_v17  ;;  %v1444_v5 = vadd.f32 %v2460_v26, %v1405_v48  ;;  %v1406_v49 = vmul.f32 %v2450_v56, %v1367_v23  ;;  %v1364_v15 = vmul.f32 %v1869_v34, %v2336_v41  ;;  %v1240_v44 = vpop.xlane.xlu0 %1239 }
 0x2f0   : > { %v1871_v22 = vpop.eup %1870  ;;  %1510 = vst.msk [vmem:[%s2471_s27 + $0x48] sm:$0xff] %vm480_vm1, %v1478_v47  ;;  %1884 = vrsqrt.f32 %v1308_v9  ;;  %v1309_v37 = vadd.f32 1e-05, %v1277_v60  ;;  %v1282_v3 = vmul.f32 0.125, %v1240_v44 }
 0x2f1   : > { %v1483_v50 = vmul.f32 %v2464_v7, %v1444_v5  ;;  %v1445_v10 = vadd.f32 %v2460_v26, %v1406_v49  ;;  %v1403_v13 = vmul.f32 %v2450_v56, %v1364_v15  ;;  %v1365_v8 = vmul.f32 %v1871_v22, %v2342_v55  ;;  %v1243_v61 = vpop.xlane.xlu1 %1242 }
 0x2f2   : > { %v1873_v30 = vpop.eup %1872  ;;  %1886 = vrsqrt.f32 %v1309_v37  ;;  %v1314_v41 = vadd.f32 1e-05, %v1282_v3  ;;  %v1283_v51 = vmul.f32 0.125, %v1243_v61 }
 0x2f3   : > { %1515 = vst.msk [vmem:[%s2471_s27 + $0x70] sm:$0xff] %vm480_vm1, %v1483_v50  ;;  %v1484_v2 = vmul.f32 %v2464_v7, %v1445_v10  ;;  %v1442_v16 = vadd.f32 %v2460_v26, %v1403_v13  ;;  %v1404_v35 = vmul.f32 %v2450_v56, %v1365_v8  ;;  %v1370_v20 = vmul.f32 %v1873_v30, %v2348_v46  ;;  %v1234_v59 = vpop.xlane.xlu0 %1233 }
 0x2f4   : > { %v1875_v24 = vpop.eup %1874  ;;  %1888 = vrsqrt.f32 %v1314_v41  ;;  %v1315_v55 = vadd.f32 1e-05, %v1283_v51  ;;  %v1280_v33 = vmul.f32 0.125, %v1234_v59 }
 0x2f5   : > { %1516 = vst.msk [vmem:[%s2471_s27 + $0x78] sm:$0xff] %vm480_vm1, %v1484_v2  ;;  %v1481_v28 = vmul.f32 %v2464_v7, %v1442_v16  ;;  %v1443_v14 = vadd.f32 %v2460_v26, %v1404_v35  ;;  %v1409_v31 = vmul.f32 %v2450_v56, %v1370_v20  ;;  %v1371_v29 = vmul.f32 %v1875_v24, %v2354_v4  ;;  %v1237_v36 = vpop.xlane.xlu1 %1236 }
 0x2f6   : > { %v1877_v6 = vpop.eup %1876  ;;  %1890 = vrsqrt.f32 %v1315_v55  ;;  %v1312_v46 = vadd.f32 1e-05, %v1280_v33  ;;  %v1281_v38 = vmul.f32 0.125, %v1237_v36 }
 0x2f7   : > { %v1879_v19 = vpop.eup %1878  ;;  %1513 = vst.msk [vmem:[%s2471_s27 + $0x60] sm:$0xff] %vm480_vm1, %v1481_v28  ;;  %v1482_v39 = vmul.f32 %v2464_v7, %v1443_v14  ;;  %v1448_v43 = vadd.f32 %v2460_v26, %v1409_v31  ;;  %v1410_v62 = vmul.f32 %v2450_v56, %v1371_v29  ;;  %v1368_v45 = vmul.f32 %v1877_v6, %v2360_v53  ;;  %v1246_v0 = vpop.xlane.xlu0 %1245 }
 0x2f8   : > { %v1369_v4 = vmul.f32 %v1879_v19, %v2366_v11  ;;  %1892 = vrsqrt.f32 %v1312_v46  ;;  %v1313_v32 = vadd.f32 1e-05, %v1281_v38  ;;  %v1284_v17 = vmul.f32 0.125, %v1246_v0 }
 0x2f9   : > { %1514 = vst.msk [vmem:[%s2471_s27 + $0x68] sm:$0xff] %vm480_vm1, %v1482_v39  ;;  %v1487_v48 = vmul.f32 %v2464_v7, %v1448_v43  ;;  %v1449_v23 = vadd.f32 %v2460_v26, %v1410_v62  ;;  %v1407_v52 = vmul.f32 %v2450_v56, %v1368_v45 }
 0x2fa   : > { %v1881_v34 = vpop.eup %1880  ;;  %v1408_v47 = vmul.f32 %v2450_v56, %v1369_v4  ;;  %1894 = vrsqrt.f32 %v1313_v32  ;;  %v1316_v53 = vadd.f32 1e-05, %v1284_v17 }
 0x2fb   : > { %v1883_v9 = vpop.eup %1882  ;;  %1519 = vst.msk [vmem:[%s2471_s27 + $0x90] sm:$0xff] %vm480_vm1, %v1487_v48  ;;  %v1488_v11 = vmul.f32 %v2464_v7, %v1449_v23  ;;  %v1446_v60 = vadd.f32 %v2460_v26, %v1407_v52  ;;  %v1374_v5 = vmul.f32 %v1881_v34, %v2372_v58  ;;  %v1249_v49 = vpop.xlane.xlu1 %1248 }
 0x2fc   : > { %v1252_v15 = vpop.xlane.xlu0 %1251  ;;  %v1447_v44 = vadd.f32 %v2460_v26, %v1408_v47  ;;  %v1375_v22 = vmul.f32 %v1883_v9, %v2378_v42  ;;  %1896 = vrsqrt.f32 %v1316_v53  ;;  %v1285_v37 = vmul.f32 0.125, %v1249_v49 }
 0x2fd   : > { %v1885_v3 = vpop.eup %1884  ;;  %1520 = vst.msk [vmem:[%s2471_s27 + $0x98] sm:$0xff] %vm480_vm1, %v1488_v11  ;;  %v1485_v50 = vmul.f32 %v2464_v7, %v1446_v60  ;;  %v1413_v10 = vmul.f32 %v2450_v56, %v1374_v5  ;;  %v1286_v13 = vmul.f32 0.125, %v1252_v15 }
 0x2fe   : > { %v1486_v58 = vmul.f32 %v2464_v7, %v1447_v44  ;;  %v1414_v8 = vmul.f32 %v2450_v56, %v1375_v22  ;;  %v1372_v61 = vmul.f32 %v1885_v3, %v2384_v1  ;;  %v1317_v30 = vadd.f32 1e-05, %v1285_v37 }
 0x2ff   : > { %v1887_v41 = vpop.eup %1886  ;;  %1517 = vst.msk [vmem:[%s2471_s27 + $0x80] sm:$0xff] %vm480_vm1, %v1485_v50  ;;  %v1452_v42 = vadd.f32 %v2460_v26, %v1413_v10  ;;  %v1318_v51 = vadd.f32 1e-05, %v1286_v13  ;;  %v1255_v2 = vpop.xlane.xlu1 %1254 }
 0x300   : > { %1518 = vst.msk [vmem:[%s2471_s27 + $0x88] sm:$0xff] %vm480_vm1, %v1486_v58  ;;  %v1453_v16 = vadd.f32 %v2460_v26, %v1414_v8  ;;  %v1411_v35 = vmul.f32 %v2450_v56, %v1372_v61  ;;  %v1373_v20 = vmul.f32 %v1887_v41, %v2390_v57  ;;  %1898 = vrsqrt.f32 %v1317_v30 }
 0x301   : > { %v1889_v1 = vpop.eup %1888  ;;  %v1491_v59 = vmul.f32 %v2464_v7, %v1452_v42  ;;  %1900 = vrsqrt.f32 %v1318_v51  ;;  %v1287_v24 = vmul.f32 0.125, %v1255_v2 }
 0x302   : > { %v1492_v55 = vmul.f32 %v2464_v7, %v1453_v16  ;;  %v1450_v33 = vadd.f32 %v2460_v26, %v1411_v35  ;;  %v1412_v28 = vmul.f32 %v2450_v56, %v1373_v20  ;;  %v1378_v14 = vmul.f32 %v1889_v1, %v2396_v21 }
 0x303   : > { %v1891_v31 = vpop.eup %1890  ;;  %1523 = vst.msk [vmem:[%s2471_s27 + $0xb0] sm:$0xff] %vm480_vm1, %v1491_v59  ;;  %v1319_v57 = vadd.f32 1e-05, %v1287_v24 }
 0x304   : > { %1524 = vst.msk [vmem:[%s2471_s27 + $0xb8] sm:$0xff] %vm480_vm1, %v1492_v55  ;;  %v1489_v29 = vmul.f32 %v2464_v7, %v1450_v33  ;;  %v1451_v36 = vadd.f32 %v2460_v26, %v1412_v28  ;;  %v1417_v6 = vmul.f32 %v2450_v56, %v1378_v14  ;;  %v1379_v46 = vmul.f32 %v1891_v31, %v2402_v12 }
 0x305   : > { %v1893_v38 = vpop.eup %1892  ;;  %1902 = vrsqrt.f32 %v1319_v57 }
 0x306   : > { %1521 = vst.msk [vmem:[%s2471_s27 + $0xa0] sm:$0xff] %vm480_vm1, %v1489_v29  ;;  %v1490_v21 = vmul.f32 %v2464_v7, %v1451_v36  ;;  %v1456_v19 = vadd.f32 %v2460_v26, %v1417_v6  ;;  %v1418_v39 = vmul.f32 %v2450_v56, %v1379_v46  ;;  %v1376_v43 = vmul.f32 %v1893_v38, %v2408_v18 }
 0x307   : > { %v1895_v62 = vpop.eup %1894 }
 0x308   : > { %1522 = vst.msk [vmem:[%s2471_s27 + $0xa8] sm:$0xff] %vm480_vm1, %v1490_v21  ;;  %v1495_v45 = vmul.f32 %v2464_v7, %v1456_v19  ;;  %v1457_v12 = vadd.f32 %v2460_v26, %v1418_v39  ;;  %v1415_v0 = vmul.f32 %v2450_v56, %v1376_v43  ;;  %v1377_v4 = vmul.f32 %v1895_v62, %v2414_v25 }
 0x309   : > { %v1897_v32 = vpop.eup %1896 }
 0x30a   : > { %1527 = vst.msk [vmem:[%s2471_s27 + $0xd0] sm:$0xff] %vm480_vm1, %v1495_v45  ;;  %v1496_v17 = vmul.f32 %v2464_v7, %v1457_v12  ;;  %v1454_v18 = vadd.f32 %v2460_v26, %v1415_v0  ;;  %v1416_v48 = vmul.f32 %v2450_v56, %v1377_v4  ;;  %v1380_v23 = vmul.f32 %v1897_v32, %v2420_v27 }
 0x30c   : > { %1528 = vst.msk [vmem:[%s2471_s27 + $0xd8] sm:$0xff] %vm480_vm1, %v1496_v17  ;;  %v1493_v52 = vmul.f32 %v2464_v7, %v1454_v18  ;;  %v1455_v34 = vadd.f32 %v2460_v26, %v1416_v48  ;;  %v1419_v25 = vmul.f32 %v2450_v56, %v1380_v23 }
 0x30d   : > { %v1899_v47 = vpop.eup %1898 }
 0x30e   : > { %v1901_v53 = vpop.eup %1900  ;;  %1525 = vst.msk [vmem:[%s2471_s27 + $0xc0] sm:$0xff] %vm480_vm1, %v1493_v52  ;;  %v1494_v9 = vmul.f32 %v2464_v7, %v1455_v34  ;;  %v1458_v11 = vadd.f32 %v2460_v26, %v1419_v25  ;;  %v1381_v27 = vmul.f32 %v1899_v47, %v2429_v54 }
 0x30f   : > { %v1382_v60 = vmul.f32 %v1901_v53, %v2432_v40 }
 0x310   : > { %1526 = vst.msk [vmem:[%s2471_s27 + $0xc8] sm:$0xff] %vm480_vm1, %v1494_v9  ;;  %v1497_v5 = vmul.f32 %v2464_v7, %v1458_v11  ;;  %v1420_v49 = vmul.f32 %v2450_v56, %v1381_v27 }
 0x311   : > { %v1421_v15 = vmul.f32 %v2450_v56, %v1382_v60 }
 0x312   : > { %v1903_v44 = vpop.eup %1902  ;;  %1529 = vst.msk [vmem:[%s2471_s27 + $0xe0] sm:$0xff] %vm480_vm1, %v1497_v5  ;;  %v1459_v22 = vadd.f32 %v2460_v26, %v1420_v49 }
 0x313   : > { %v1460_v37 = vadd.f32 %v2460_v26, %v1421_v15  ;;  %v1383_v54 = vmul.f32 %v1903_v44, %v2440_v63 }
 0x314   : > { %v1498_v40 = vmul.f32 %v2464_v7, %v1459_v22 }
 0x315   : > { %v1499_v3 = vmul.f32 %v2464_v7, %v1460_v37  ;;  %v1422_v50 = vmul.f32 %v2450_v56, %v1383_v54 }
 0x316   : > { %1530 = vst.msk [vmem:[%s2471_s27 + $0xe8] sm:$0xff] %vm480_vm1, %v1498_v40 }
 0x317   : > { %1531 = vst.msk [vmem:[%s2471_s27 + $0xf0] sm:$0xff] %vm480_vm1, %v1499_v3  ;;  %v1461_v10 = vadd.f32 %v2460_v26, %v1422_v50 }
 0x319   : > { %v1500_v13 = vmul.f32 %v2464_v7, %v1461_v10 }
 0x31b   : > { %1532 = vst.msk [vmem:[%s2471_s27 + $0xf8] sm:$0xff] %vm480_vm1, %v1500_v13 }
 0x31c PF: > { %s18_s29 = sadd.s32 1, %s1926_s29   ;;  %s2679_s27 = smov %s1922_s28 }
 0x31d   : > { %p15_p5 = scmp.ge.s32.totalorder %s18_s29, 4   ;;  %s2680_s28 = smov %s2682_s30 }
 0x31f   :  { %17 = sbr.rel (!%p15_p5) target bundleno = 2 (0x2), region = 85 }

</bundles_post_ra>
